<compile_context>
chip_gen: v7x
topology: tpu7x:2x2x1
jax: 0.10.0
libtpu: 0.0.40
codegen_flags: <defaults>
</compile_context>

<pallas_src>
import functools

import jax
import jax.numpy as jnp
from jax.experimental import pallas as pl
from jax.experimental.pallas import tpu as pltpu

AVG_N = 100               # number of random (rotation, force) samples per batch row
AVG_PAD = 128             # padded to full lane width -> aligned reshape + lane-dense max
MXU_DTYPE = jnp.bfloat16  # MXU operand dtype; accumulation stays f32


def _mm(a, w_ref):
    """MXU matmul: bf16 operands, f32 accumulation."""
    return jnp.dot(a.astype(MXU_DTYPE), w_ref[...],
                   preferred_element_type=jnp.float32)


# --------------------------------------------------------------------------
# Fused forward kernel
# --------------------------------------------------------------------------
def _fused_forward_kernel(
        patch_ref, xc_ref, obs_ref, skill_ref, rf_ref, samp_ref,
        dc_w, dc_b, df_w, df_b,
        pn_w1, pn_b1, pn_w2, pn_b2,
        enc_wd, enc_wo, enc_ws, enc_b1, enc_w2, enc_b2,
        sc_wt, sc_wp, sc_wrf, sc_b1, sc_w2, sc_b2,
        pc_wt, pc_wp, pc_b1, pc_w2, pc_b2,
        pol_wt, pol_wd, pol_wp, pol_b1, pol_w2, pol_b2,
        o_ref, *, B, HW, N):
    # ---- DepthEncoder: 3x3 conv (im2col matmul) + relu + global mean + fc + relu
    h = jnp.maximum(_mm(patch_ref[...], dc_w) + dc_b[...], 0.0)        # (B*HW, 16)
    pooled = jnp.mean(h.reshape(B, HW, h.shape[-1]), axis=1)           # (B, 16)
    depth_emb = jnp.maximum(_mm(pooled, df_w) + df_b[...], 0.0)        # (B, 128)

    # ---- PointNet: per-point MLP (flattened to 2-D matmuls) + max pool
    g = jnp.maximum(_mm(xc_ref[...], pn_w1) + pn_b1[...], 0.0)         # (B*N, 64)
    g = jnp.maximum(_mm(g, pn_w2) + pn_b2[...], 0.0)                   # (B*N, 128)
    pf = jnp.max(g.reshape(B, N, g.shape[-1]), axis=1)                 # (B, 128)

    # ---- Task encoder: split-weight form of concat([depth_emb, obs, skill]) @ W1
    # TODO(synk): exact CPCModel/CURLModel/TaskCVAEModel internals unavailable;
    # synthetic MLP with identical interface and output shape (B, 64).
    e = jnp.maximum(_mm(depth_emb, enc_wd) + _mm(obs_ref[...], enc_wo)
                    + _mm(skill_ref[...], enc_ws) + enc_b1[...], 0.0)
    task = _mm(e, enc_w2) + enc_b2[...]                                # (B, 64)

    # ---- shared (task, pf) hidden contribution for the ScoreCritic
    sc_tp = _mm(task, sc_wt) + _mm(pf, sc_wp) + sc_b1[...]             # (B, 128)

    # ScoreCritic on the observed rotation/force -> critic_pred
    hc = jnp.maximum(sc_tp + _mm(rf_ref[...], sc_wrf), 0.0)            # (B, 128)
    critic = jnp.sum(hc * sc_w2[...], axis=-1, keepdims=True) + sc_b2[...]   # (B, 1)

    # PointCritic -> point_score
    hp = jnp.maximum(_mm(task, pc_wt) + _mm(pf, pc_wp) + pc_b1[...], 0.0)
    pscore = jnp.sum(hp * pc_w2[...], axis=-1, keepdims=True) + pc_b2[...]   # (B, 1)

    # ActionPolicy -> rot(8) + force(3), output padded to 16 lanes
    hq = jnp.maximum(_mm(task, pol_wt) + _mm(depth_emb, pol_wd)
                     + _mm(pf, pol_wp) + pol_b1[...], 0.0)
    pol = _mm(hq, pol_w2) + pol_b2[...]                                # (B, 16)

    # compute_point_score_label: max over AVG_N random (rotation, force) samples.
    # One flat 2-D MXU pass over the padded samples; (task, pf) part is sc_tp.
    s = _mm(samp_ref[...], sc_wrf)                                     # (B*AVG_PAD, 128)
    hs = jnp.maximum(s.reshape(B, AVG_PAD, s.shape[-1])                # tile-aligned
                     + sc_tp[:, None, :], 0.0)                         # (B, AVG_PAD, 128)
    scores = jnp.sum(hs * sc_w2[...][None], axis=-1)                   # (B, AVG_PAD)
    lane = jax.lax.broadcasted_iota(jnp.int32, scores.shape, 1)
    scores = jnp.where(lane < AVG_N, scores, -jnp.inf)                 # mask padding
    score_label = jnp.max(scores, axis=1, keepdims=True) + sc_b2[...]  # (B, 1)

    # ---- lane-dense packed output slab:
    # cols [0:8] rot_raw | [8:11] force_raw | [11:16] pad | 16 critic | 17 pscore
    # | 18 score_label | rest zeros
    slab = jnp.concatenate(
        [pol, critic, pscore, score_label,
         jnp.zeros((B, 128 - pol.shape[-1] - 3), jnp.float32)], axis=-1)
    o_ref[...] = slab


PARAM_ORDER = (
    "dc_w", "dc_b", "df_w", "df_b",
    "pn_w1", "pn_b1", "pn_w2", "pn_b2",
    "enc_wd", "enc_wo", "enc_ws", "enc_b1", "enc_w2", "enc_b2",
    "sc_wt", "sc_wp", "sc_wrf", "sc_b1", "sc_w2", "sc_b2",
    "pc_wt", "pc_wp", "pc_b1", "pc_w2", "pc_b2",
    "pol_wt", "pol_wd", "pol_wp", "pol_b1", "pol_w2", "pol_b2",
)


def _full_spec(a):
    zeros = (0,) * a.ndim
    return pl.BlockSpec(a.shape, lambda i, z=zeros: z)


def fused_forward(params, patches, xc, obs, skill, rf, samp, *, B, HW, N):
    data = (patches, xc, obs, skill, rf, samp)
    weights = tuple(params[k] for k in PARAM_ORDER)
    args = data + weights
    kernel = functools.partial(_fused_forward_kernel, B=B, HW=HW, N=N)
    return pl.pallas_call(
        kernel,
        out_shape=jax.ShapeDtypeStruct((B, 128), jnp.float32),
        grid=(1,),
        in_specs=[_full_spec(a) for a in args],
        out_specs=pl.BlockSpec((B, 128), lambda i: (0, 0)),
        compiler_params=pltpu.CompilerParams(
            dimension_semantics=("arbitrary",)),
    )(*args)


# --------------------------------------------------------------------------
# JAX glue (im2col, quaternion math, parameters, wrapper)
# --------------------------------------------------------------------------
def im2col_3x3(d):
    """d: (B, C, H, W) NCHW -> (B, H*W, C*9) patches (same padding, taps last)."""
    B, C, H, W = d.shape
    dp = jnp.pad(d, ((0, 0), (0, 0), (1, 1), (1, 1)))
    taps = [dp[:, :, dy:dy + H, dx:dx + W] for dy in range(3) for dx in range(3)]
    patches = jnp.stack(taps, axis=-1)                     # (B, C, H, W, 9)
    patches = jnp.transpose(patches, (0, 2, 3, 1, 4))      # (B, H, W, C, 9)
    return patches.reshape(B, H * W, C * 9)


def quat_multiply(p, q):
    """Compose rotations p * q, quaternions in scipy xyzw convention."""
    px, py, pz, pw = p[..., 0], p[..., 1], p[..., 2], p[..., 3]
    qx, qy, qz, qw = q[..., 0], q[..., 1], q[..., 2], q[..., 3]
    rx = pw * qx + px * qw + py * qz - pz * qy
    ry = pw * qy - px * qz + py * qw + pz * qx
    rz = pw * qz + px * qy - py * qx + pz * qw
    rw = pw * qw - px * qx - py * qy - pz * qz
    return jnp.stack([rx, ry, rz, rw], axis=-1)


def init_params(key):
    def dense(k, shape, fan_in, dtype=MXU_DTYPE):
        return (jax.random.normal(k, shape, jnp.float32)
                / jnp.sqrt(float(fan_in))).astype(dtype)

    ks = jax.random.split(key, 19)
    p = {}
    # DepthEncoder(c_dim=128, in_channel=1): conv3x3(1->16) + fc(16->128)
    dc = dense(ks[0], (9, 16), 9)
    p["dc_w"] = jnp.concatenate([dc, jnp.zeros((7, 16), dc.dtype)], 0)   # K pad 9->16
    p["dc_b"] = jnp.zeros((1, 16), jnp.float32)
    p["df_w"] = dense(ks[1], (16, 128), 16)
    p["df_b"] = jnp.zeros((1, 128), jnp.float32)
    # point network ([x||pos]: 6 -> 64 -> 128, max pool); K padded 6 -> 8
    pw1 = dense(ks[2], (6, 64), 6)
    p["pn_w1"] = jnp.concatenate([pw1, jnp.zeros((2, 64), pw1.dtype)], 0)
    p["pn_b1"] = jnp.zeros((1, 64), jnp.float32)
    p["pn_w2"] = dense(ks[3], (64, 128), 64)
    p["pn_b2"] = jnp.zeros((1, 128), jnp.float32)
    # task encoder: [depth_emb 128 || obs 32 || skill 64] -> 128 -> 64 (row-split W1)
    p["enc_wd"] = dense(ks[4], (128, 128), 224)
    p["enc_wo"] = dense(ks[5], (32, 128), 224)
    p["enc_ws"] = dense(ks[6], (64, 128), 224)
    p["enc_b1"] = jnp.zeros((1, 128), jnp.float32)
    p["enc_w2"] = dense(ks[7], (128, 64), 128)
    p["enc_b2"] = jnp.zeros((1, 64), jnp.float32)
    # ScoreCritic: [task 64 || pf 128 || rot 8 || force 3] -> 128 -> 1 (row-split W1)
    p["sc_wt"] = dense(ks[8], (64, 128), 203)
    p["sc_wp"] = dense(ks[9], (128, 128), 203)
    rf_w = dense(ks[10], (11, 128), 203)
    p["sc_wrf"] = jnp.concatenate([rf_w, jnp.zeros((5, 128), rf_w.dtype)], 0)  # 11->16
    p["sc_b1"] = jnp.zeros((1, 128), jnp.float32)
    p["sc_w2"] = dense(ks[11], (1, 128), 128, dtype=jnp.float32)  # row form, VPU dot
    p["sc_b2"] = jnp.zeros((1, 1), jnp.float32)
    # PointCritic: [task 64 || pf 128] -> 128 -> 1
    p["pc_wt"] = dense(ks[12], (64, 128), 192)
    p["pc_wp"] = dense(ks[13], (128, 128), 192)
    p["pc_b1"] = jnp.zeros((1, 128), jnp.float32)
    p["pc_w2"] = dense(ks[14], (1, 128), 128, dtype=jnp.float32)
    p["pc_b2"] = jnp.zeros((1, 1), jnp.float32)
    # ActionPolicy: [task 64 || depth_emb 128 || pf 128] -> 128 -> 11 (padded to 16)
    p["pol_wt"] = dense(ks[15], (64, 128), 320)
    p["pol_wd"] = dense(ks[16], (128, 128), 320)
    p["pol_wp"] = dense(ks[17], (128, 128), 320)
    p["pol_b1"] = jnp.zeros((1, 128), jnp.float32)
    pw2 = dense(ks[18], (128, 11), 128)
    p["pol_w2"] = jnp.concatenate([pw2, jnp.zeros((128, 5), pw2.dtype)], 1)    # 11->16
    p["pol_b2"] = jnp.zeros((1, 16), jnp.float32)
    return p


def wrapper_forward(params, x, y, pos, obs, camera_id, rng):
    """Mirrors Wrapper.forward (cic/curl branch). camera_id unused (as in torch)."""
    label, rotations, force, depth = y
    B, N = x.shape[0], x.shape[1]
    depth = depth[:, 0, ...]                               # (B, 1, H, W) NCHW
    H, W = depth.shape[-2], depth.shape[-1]
    HW = H * W

    k_skill, k_rot, k_force = jax.random.split(rng, 3)
    skill = jax.random.normal(k_skill, (B, 64), jnp.float32)   # torch.empty(..).normal_()

    # im2col'd depth patches, contraction padded 9 -> 16 to match padded conv weight
    patches = im2col_3x3(depth).reshape(B * HW, 9)
    patches = jnp.pad(patches, ((0, 0), (0, 7)))

    # point network input: concat(x, pos), flattened to 2-D, K padded 6 -> 8
    xc = jnp.concatenate([x, pos], axis=-1).reshape(B * N, 6)
    xc = jnp.pad(xc, ((0, 0), (0, 2)))

    # observed (rotation, force) features for the ScoreCritic head, padded 11 -> 16
    rf = jnp.concatenate([rotations.reshape(B, 8), force,
                          jnp.zeros((B, 5), jnp.float32)], axis=-1)

    # random (rotation, force) samples for compute_point_score_label;
    # padded 100 -> 128 samples (masked to -inf in-kernel) and flattened to 2-D.
    quat = jax.random.normal(k_rot, (B, AVG_N, 4), jnp.float32)
    quat = quat / jnp.linalg.norm(quat, axis=-1, keepdims=True)
    z_pi = jnp.array([0.0, 0.0, 1.0, 0.0], jnp.float32)    # rotvec pi about z (xyzw)
    rot = jnp.stack([quat, quat_multiply(quat, z_pi)], axis=2).reshape(B, AVG_N, 8)
    forces = jax.random.uniform(k_force, (B, AVG_N, 3), jnp.float32)
    samp = jnp.concatenate([rot, forces,
                            jnp.zeros((B, AVG_N, 5), jnp.float32)], axis=-1)  # (B,100,16)
    samp = jnp.pad(samp, ((0, 0), (0, AVG_PAD - AVG_N), (0, 0)))              # (B,128,16)
    samp = samp.reshape(B * AVG_PAD, 16)

    # matmul-only inputs go to the kernel already in bf16 (MXU lhs dtype)
    bf = lambda a: a.astype(MXU_DTYPE)
    slab = fused_forward(params, bf(patches), bf(xc), bf(obs), bf(skill),
                         bf(rf), bf(samp), B=B, HW=HW, N=N)     # (B, 128)

    rot_raw = slab[:, :8].reshape(B, 2, 4)
    rot_pred = rot_raw / (jnp.linalg.norm(rot_raw, axis=-1, keepdims=True) + 1e-8)
    force_pred = jax.nn.sigmoid(slab[:, 8:11])             # (B, 3)
    critic_pred = slab[:, 16:17]                           # (B, 1)
    point_score = slab[:, 17:18]                           # (B, 1)
    point_score_label = jax.lax.stop_gradient(slab[:, 18]) # (B,) detached label

    return point_score, rot_pred, force_pred, critic_pred, point_score_label


if __name__ == "__main__":
    key = jax.random.PRNGKey(0)
    kp, kx, kpos, kobs, kd, kq, kf, krun = jax.random.split(key, 8)

    B, N, H, W = 2, 64, 16, 16
    params = init_params(kp)

    x = jax.random.normal(kx, (B, N, 3), jnp.float32)           # point features
    pos = jax.random.normal(kpos, (B, N, 3), jnp.float32)       # point positions
    obs = jax.random.normal(kobs, (B, 32), jnp.float32)         # observation vector
    depth = jax.random.normal(kd, (B, 1, 1, H, W), jnp.float32) # y[3]; [:,0] -> NCHW
    label = jnp.zeros((B,), jnp.int32)
    q = jax.random.normal(kq, (B, 4), jnp.float32)
    q = q / jnp.linalg.norm(q, axis=-1, keepdims=True)
    z_pi = jnp.array([0.0, 0.0, 1.0, 0.0], jnp.float32)
    rotations = jnp.stack([q, quat_multiply(q, z_pi)], axis=1)  # (B, 2, 4)
    force = jax.random.uniform(kf, (B, 3), jnp.float32)
    camera_id = jnp.zeros((B,), jnp.int32)
    y = (label, rotations, force, depth)

    fwd = jax.jit(wrapper_forward)
    outs = fwd(params, x, y, pos, obs, camera_id, krun)
    outs = jax.block_until_ready(outs)
    point_score, rot_pred, force_pred, critic_pred, point_score_label = outs

    assert point_score.shape == (B, 1)
    assert rot_pred.shape == (B, 2, 4)
    assert force_pred.shape == (B, 3)
    assert critic_pred.shape == (B, 1)
    assert point_score_label.shape == (B,)
    assert all(bool(jnp.all(jnp.isfinite(o))) for o in outs)
    print("KERNEL_OK")
</pallas_src>

<mosaic_0001>
module attributes {stable_mosaic.version = 11 : i64} {
  func.func @_fused_forward_kernel(%arg0: i32, %arg1: memref<512x16xbf16, #tpu.memory_space<vmem>>, %arg2: memref<128x8xbf16, #tpu.memory_space<vmem>>, %arg3: memref<2x32xbf16, #tpu.memory_space<vmem>>, %arg4: memref<2x64xbf16, #tpu.memory_space<vmem>>, %arg5: memref<2x16xbf16, #tpu.memory_space<vmem>>, %arg6: memref<256x16xbf16, #tpu.memory_space<vmem>>, %arg7: memref<16x16xbf16, #tpu.memory_space<vmem>>, %arg8: memref<1x16xf32, #tpu.memory_space<vmem>>, %arg9: memref<16x128xbf16, #tpu.memory_space<vmem>>, %arg10: memref<1x128xf32, #tpu.memory_space<vmem>>, %arg11: memref<8x64xbf16, #tpu.memory_space<vmem>>, %arg12: memref<1x64xf32, #tpu.memory_space<vmem>>, %arg13: memref<64x128xbf16, #tpu.memory_space<vmem>>, %arg14: memref<1x128xf32, #tpu.memory_space<vmem>>, %arg15: memref<128x128xbf16, #tpu.memory_space<vmem>>, %arg16: memref<32x128xbf16, #tpu.memory_space<vmem>>, %arg17: memref<64x128xbf16, #tpu.memory_space<vmem>>, %arg18: memref<1x128xf32, #tpu.memory_space<vmem>>, %arg19: memref<128x64xbf16, #tpu.memory_space<vmem>>, %arg20: memref<1x64xf32, #tpu.memory_space<vmem>>, %arg21: memref<64x128xbf16, #tpu.memory_space<vmem>>, %arg22: memref<128x128xbf16, #tpu.memory_space<vmem>>, %arg23: memref<16x128xbf16, #tpu.memory_space<vmem>>, %arg24: memref<1x128xf32, #tpu.memory_space<vmem>>, %arg25: memref<1x128xf32, #tpu.memory_space<vmem>>, %arg26: memref<1x1xf32, #tpu.memory_space<vmem>>, %arg27: memref<64x128xbf16, #tpu.memory_space<vmem>>, %arg28: memref<128x128xbf16, #tpu.memory_space<vmem>>, %arg29: memref<1x128xf32, #tpu.memory_space<vmem>>, %arg30: memref<1x128xf32, #tpu.memory_space<vmem>>, %arg31: memref<1x1xf32, #tpu.memory_space<vmem>>, %arg32: memref<64x128xbf16, #tpu.memory_space<vmem>>, %arg33: memref<128x128xbf16, #tpu.memory_space<vmem>>, %arg34: memref<128x128xbf16, #tpu.memory_space<vmem>>, %arg35: memref<1x128xf32, #tpu.memory_space<vmem>>, %arg36: memref<128x16xbf16, #tpu.memory_space<vmem>>, %arg37: memref<1x16xf32, #tpu.memory_space<vmem>>, %arg38: memref<2x128xf32, #tpu.memory_space<vmem>>) attributes {dimension_semantics = [#tpu.dimension_semantics<arbitrary>], iteration_bounds = array<i64: 1>, scalar_prefetch = 0 : i64, scratch_operands = 0 : i64, tpu.core_type = #tpu.core_type<tc>, window_params = [{pipeline_mode = #tpu.pipeline_mode<synchronous>, transform_indices = @transform_0, window_bounds = array<i64: 512, 16>}, {pipeline_mode = #tpu.pipeline_mode<synchronous>, transform_indices = @transform_1, window_bounds = array<i64: 128, 8>}, {pipeline_mode = #tpu.pipeline_mode<synchronous>, transform_indices = @transform_2, window_bounds = array<i64: 2, 32>}, {pipeline_mode = #tpu.pipeline_mode<synchronous>, transform_indices = @transform_3, window_bounds = array<i64: 2, 64>}, {pipeline_mode = #tpu.pipeline_mode<synchronous>, transform_indices = @transform_4, window_bounds = array<i64: 2, 16>}, {pipeline_mode = #tpu.pipeline_mode<synchronous>, transform_indices = @transform_5, window_bounds = array<i64: 256, 16>}, {pipeline_mode = #tpu.pipeline_mode<synchronous>, transform_indices = @transform_6, window_bounds = array<i64: 16, 16>}, {pipeline_mode = #tpu.pipeline_mode<synchronous>, transform_indices = @transform_7, window_bounds = array<i64: 1, 16>}, {pipeline_mode = #tpu.pipeline_mode<synchronous>, transform_indices = @transform_8, window_bounds = array<i64: 16, 128>}, {pipeline_mode = #tpu.pipeline_mode<synchronous>, transform_indices = @transform_9, window_bounds = array<i64: 1, 128>}, {pipeline_mode = #tpu.pipeline_mode<synchronous>, transform_indices = @transform_10, window_bounds = array<i64: 8, 64>}, {pipeline_mode = #tpu.pipeline_mode<synchronous>, transform_indices = @transform_11, window_bounds = array<i64: 1, 64>}, {pipeline_mode = #tpu.pipeline_mode<synchronous>, transform_indices = @transform_12, window_bounds = array<i64: 64, 128>}, {pipeline_mode = #tpu.pipeline_mode<synchronous>, transform_indices = @transform_13, window_bounds = array<i64: 1, 128>}, {pipeline_mode = #tpu.pipeline_mode<synchronous>, transform_indices = @transform_14, window_bounds = array<i64: 128, 128>}, {pipeline_mode = #tpu.pipeline_mode<synchronous>, transform_indices = @transform_15, window_bounds = array<i64: 32, 128>}, {pipeline_mode = #tpu.pipeline_mode<synchronous>, transform_indices = @transform_16, window_bounds = array<i64: 64, 128>}, {pipeline_mode = #tpu.pipeline_mode<synchronous>, transform_indices = @transform_17, window_bounds = array<i64: 1, 128>}, {pipeline_mode = #tpu.pipeline_mode<synchronous>, transform_indices = @transform_18, window_bounds = array<i64: 128, 64>}, {pipeline_mode = #tpu.pipeline_mode<synchronous>, transform_indices = @transform_19, window_bounds = array<i64: 1, 64>}, {pipeline_mode = #tpu.pipeline_mode<synchronous>, transform_indices = @transform_20, window_bounds = array<i64: 64, 128>}, {pipeline_mode = #tpu.pipeline_mode<synchronous>, transform_indices = @transform_21, window_bounds = array<i64: 128, 128>}, {pipeline_mode = #tpu.pipeline_mode<synchronous>, transform_indices = @transform_22, window_bounds = array<i64: 16, 128>}, {pipeline_mode = #tpu.pipeline_mode<synchronous>, transform_indices = @transform_23, window_bounds = array<i64: 1, 128>}, {pipeline_mode = #tpu.pipeline_mode<synchronous>, transform_indices = @transform_24, window_bounds = array<i64: 1, 128>}, {pipeline_mode = #tpu.pipeline_mode<synchronous>, transform_indices = @transform_25, window_bounds = array<i64: 1, 1>}, {pipeline_mode = #tpu.pipeline_mode<synchronous>, transform_indices = @transform_26, window_bounds = array<i64: 64, 128>}, {pipeline_mode = #tpu.pipeline_mode<synchronous>, transform_indices = @transform_27, window_bounds = array<i64: 128, 128>}, {pipeline_mode = #tpu.pipeline_mode<synchronous>, transform_indices = @transform_28, window_bounds = array<i64: 1, 128>}, {pipeline_mode = #tpu.pipeline_mode<synchronous>, transform_indices = @transform_29, window_bounds = array<i64: 1, 128>}, {pipeline_mode = #tpu.pipeline_mode<synchronous>, transform_indices = @transform_30, window_bounds = array<i64: 1, 1>}, {pipeline_mode = #tpu.pipeline_mode<synchronous>, transform_indices = @transform_31, window_bounds = array<i64: 64, 128>}, {pipeline_mode = #tpu.pipeline_mode<synchronous>, transform_indices = @transform_32, window_bounds = array<i64: 128, 128>}, {pipeline_mode = #tpu.pipeline_mode<synchronous>, transform_indices = @transform_33, window_bounds = array<i64: 128, 128>}, {pipeline_mode = #tpu.pipeline_mode<synchronous>, transform_indices = @transform_34, window_bounds = array<i64: 1, 128>}, {pipeline_mode = #tpu.pipeline_mode<synchronous>, transform_indices = @transform_35, window_bounds = array<i64: 128, 16>}, {pipeline_mode = #tpu.pipeline_mode<synchronous>, transform_indices = @transform_36, window_bounds = array<i64: 1, 16>}, {pipeline_mode = #tpu.pipeline_mode<synchronous>, transform_indices = @transform_37, window_bounds = array<i64: 2, 128>}]} {
    %c0 = arith.constant 0 : index
    %c0_0 = arith.constant 0 : index
    %0 = vector.load %arg1[%c0, %c0_0] : memref<512x16xbf16, #tpu.memory_space<vmem>>, vector<512x16xbf16>
    %c0_1 = arith.constant 0 : index
    %c0_2 = arith.constant 0 : index
    %1 = vector.load %arg7[%c0_1, %c0_2] : memref<16x16xbf16, #tpu.memory_space<vmem>>, vector<16x16xbf16>
    %cst = arith.constant dense<0.000000e+00> : vector<512x16xf32>
    %2 = tpu.matmul %0, %1, %cst {dimension_numbers = #tpu.dot_dimension_numbers<[1], [0], [0], [1], [0, 0, 1, 1], [], []>} : vector<512x16xbf16>, vector<16x16xbf16>, vector<512x16xf32> -> vector<512x16xf32>
    %c0_3 = arith.constant 0 : index
    %c0_4 = arith.constant 0 : index
    %3 = vector.load %arg8[%c0_3, %c0_4] : memref<1x16xf32, #tpu.memory_space<vmem>>, vector<1x16xf32>
    %4 = vector.broadcast %3 : vector<1x16xf32> to vector<512x16xf32>
    %5 = arith.addf %2, %4 : vector<512x16xf32>
    %cst_5 = arith.constant 0.000000e+00 : f32
    %6 = vector.broadcast %cst_5 : f32 to vector<512x16xf32>
    %7 = arith.maximumf %5, %6 : vector<512x16xf32>
    %8 = vector.shape_cast %7 : vector<512x16xf32> to vector<2x256x16xf32>
    %cst_6 = arith.constant dense<0.000000e+00> : vector<2x16xf32>
    %9 = vector.multi_reduction <add>, %8, %cst_6 [1] : vector<2x256x16xf32> to vector<2x16xf32>
    %cst_7 = arith.constant 2.560000e+02 : f32
    %10 = vector.broadcast %cst_7 : f32 to vector<2x16xf32>
    %11 = arith.divf %9, %10 : vector<2x16xf32>
    %12 = arith.truncf %11 : vector<2x16xf32> to vector<2x16xbf16>
    %c0_8 = arith.constant 0 : index
    %c0_9 = arith.constant 0 : index
    %13 = vector.load %arg9[%c0_8, %c0_9] : memref<16x128xbf16, #tpu.memory_space<vmem>>, vector<16x128xbf16>
    %cst_10 = arith.constant dense<0.000000e+00> : vector<2x128xf32>
    %14 = tpu.matmul %12, %13, %cst_10 {dimension_numbers = #tpu.dot_dimension_numbers<[1], [0], [0], [1], [0, 0, 1, 1], [], []>} : vector<2x16xbf16>, vector<16x128xbf16>, vector<2x128xf32> -> vector<2x128xf32>
    %c0_11 = arith.constant 0 : index
    %c0_12 = arith.constant 0 : index
    %15 = vector.load %arg10[%c0_11, %c0_12] : memref<1x128xf32, #tpu.memory_space<vmem>>, vector<1x128xf32>
    %16 = vector.broadcast %15 : vector<1x128xf32> to vector<2x128xf32>
    %17 = arith.addf %14, %16 : vector<2x128xf32>
    %cst_13 = arith.constant 0.000000e+00 : f32
    %18 = vector.broadcast %cst_13 : f32 to vector<2x128xf32>
    %19 = arith.maximumf %17, %18 : vector<2x128xf32>
    %c0_14 = arith.constant 0 : index
    %c0_15 = arith.constant 0 : index
    %20 = vector.load %arg2[%c0_14, %c0_15] : memref<128x8xbf16, #tpu.memory_space<vmem>>, vector<128x8xbf16>
    %c0_16 = arith.constant 0 : index
    %c0_17 = arith.constant 0 : index
    %21 = vector.load %arg11[%c0_16, %c0_17] : memref<8x64xbf16, #tpu.memory_space<vmem>>, vector<8x64xbf16>
    %cst_18 = arith.constant dense<0.000000e+00> : vector<128x64xf32>
    %22 = tpu.matmul %20, %21, %cst_18 {dimension_numbers = #tpu.dot_dimension_numbers<[1], [0], [0], [1], [0, 0, 1, 1], [], []>} : vector<128x8xbf16>, vector<8x64xbf16>, vector<128x64xf32> -> vector<128x64xf32>
    %c0_19 = arith.constant 0 : index
    %c0_20 = arith.constant 0 : index
    %23 = vector.load %arg12[%c0_19, %c0_20] : memref<1x64xf32, #tpu.memory_space<vmem>>, vector<1x64xf32>
    %24 = vector.broadcast %23 : vector<1x64xf32> to vector<128x64xf32>
    %25 = arith.addf %22, %24 : vector<128x64xf32>
    %cst_21 = arith.constant 0.000000e+00 : f32
    %26 = vector.broadcast %cst_21 : f32 to vector<128x64xf32>
    %27 = arith.maximumf %25, %26 : vector<128x64xf32>
    %28 = arith.truncf %27 : vector<128x64xf32> to vector<128x64xbf16>
    %c0_22 = arith.constant 0 : index
    %c0_23 = arith.constant 0 : index
    %29 = vector.load %arg13[%c0_22, %c0_23] : memref<64x128xbf16, #tpu.memory_space<vmem>>, vector<64x128xbf16>
    %cst_24 = arith.constant dense<0.000000e+00> : vector<128x128xf32>
    %30 = tpu.matmul %28, %29, %cst_24 {dimension_numbers = #tpu.dot_dimension_numbers<[1], [0], [0], [1], [0, 0, 1, 1], [], []>} : vector<128x64xbf16>, vector<64x128xbf16>, vector<128x128xf32> -> vector<128x128xf32>
    %c0_25 = arith.constant 0 : index
    %c0_26 = arith.constant 0 : index
    %31 = vector.load %arg14[%c0_25, %c0_26] : memref<1x128xf32, #tpu.memory_space<vmem>>, vector<1x128xf32>
    %32 = vector.broadcast %31 : vector<1x128xf32> to vector<128x128xf32>
    %33 = arith.addf %30, %32 : vector<128x128xf32>
    %cst_27 = arith.constant 0.000000e+00 : f32
    %34 = vector.broadcast %cst_27 : f32 to vector<128x128xf32>
    %35 = arith.maximumf %33, %34 : vector<128x128xf32>
    %36 = vector.shape_cast %35 : vector<128x128xf32> to vector<2x64x128xf32>
    %cst_28 = arith.constant dense<0xFF800000> : vector<2x128xf32>
    %37 = vector.multi_reduction <maximumf>, %36, %cst_28 [1] : vector<2x64x128xf32> to vector<2x128xf32>
    %38 = arith.truncf %19 : vector<2x128xf32> to vector<2x128xbf16>
    %c0_29 = arith.constant 0 : index
    %c0_30 = arith.constant 0 : index
    %39 = vector.load %arg15[%c0_29, %c0_30] : memref<128x128xbf16, #tpu.memory_space<vmem>>, vector<128x128xbf16>
    %cst_31 = arith.constant dense<0.000000e+00> : vector<2x128xf32>
    %40 = tpu.matmul %38, %39, %cst_31 {dimension_numbers = #tpu.dot_dimension_numbers<[1], [0], [0], [1], [0, 0, 1, 1], [], []>} : vector<2x128xbf16>, vector<128x128xbf16>, vector<2x128xf32> -> vector<2x128xf32>
    %c0_32 = arith.constant 0 : index
    %c0_33 = arith.constant 0 : index
    %41 = vector.load %arg3[%c0_32, %c0_33] : memref<2x32xbf16, #tpu.memory_space<vmem>>, vector<2x32xbf16>
    %c0_34 = arith.constant 0 : index
    %c0_35 = arith.constant 0 : index
    %42 = vector.load %arg16[%c0_34, %c0_35] : memref<32x128xbf16, #tpu.memory_space<vmem>>, vector<32x128xbf16>
    %cst_36 = arith.constant dense<0.000000e+00> : vector<2x128xf32>
    %43 = tpu.matmul %41, %42, %cst_36 {dimension_numbers = #tpu.dot_dimension_numbers<[1], [0], [0], [1], [0, 0, 1, 1], [], []>} : vector<2x32xbf16>, vector<32x128xbf16>, vector<2x128xf32> -> vector<2x128xf32>
    %44 = arith.addf %40, %43 : vector<2x128xf32>
    %c0_37 = arith.constant 0 : index
    %c0_38 = arith.constant 0 : index
    %45 = vector.load %arg4[%c0_37, %c0_38] : memref<2x64xbf16, #tpu.memory_space<vmem>>, vector<2x64xbf16>
    %c0_39 = arith.constant 0 : index
    %c0_40 = arith.constant 0 : index
    %46 = vector.load %arg17[%c0_39, %c0_40] : memref<64x128xbf16, #tpu.memory_space<vmem>>, vector<64x128xbf16>
    %cst_41 = arith.constant dense<0.000000e+00> : vector<2x128xf32>
    %47 = tpu.matmul %45, %46, %cst_41 {dimension_numbers = #tpu.dot_dimension_numbers<[1], [0], [0], [1], [0, 0, 1, 1], [], []>} : vector<2x64xbf16>, vector<64x128xbf16>, vector<2x128xf32> -> vector<2x128xf32>
    %48 = arith.addf %44, %47 : vector<2x128xf32>
    %c0_42 = arith.constant 0 : index
    %c0_43 = arith.constant 0 : index
    %49 = vector.load %arg18[%c0_42, %c0_43] : memref<1x128xf32, #tpu.memory_space<vmem>>, vector<1x128xf32>
    %50 = vector.broadcast %49 : vector<1x128xf32> to vector<2x128xf32>
    %51 = arith.addf %48, %50 : vector<2x128xf32>
    %cst_44 = arith.constant 0.000000e+00 : f32
    %52 = vector.broadcast %cst_44 : f32 to vector<2x128xf32>
    %53 = arith.maximumf %51, %52 : vector<2x128xf32>
    %54 = arith.truncf %53 : vector<2x128xf32> to vector<2x128xbf16>
    %c0_45 = arith.constant 0 : index
    %c0_46 = arith.constant 0 : index
    %55 = vector.load %arg19[%c0_45, %c0_46] : memref<128x64xbf16, #tpu.memory_space<vmem>>, vector<128x64xbf16>
    %cst_47 = arith.constant dense<0.000000e+00> : vector<2x64xf32>
    %56 = tpu.matmul %54, %55, %cst_47 {dimension_numbers = #tpu.dot_dimension_numbers<[1], [0], [0], [1], [0, 0, 1, 1], [], []>} : vector<2x128xbf16>, vector<128x64xbf16>, vector<2x64xf32> -> vector<2x64xf32>
    %c0_48 = arith.constant 0 : index
    %c0_49 = arith.constant 0 : index
    %57 = vector.load %arg20[%c0_48, %c0_49] : memref<1x64xf32, #tpu.memory_space<vmem>>, vector<1x64xf32>
    %58 = vector.broadcast %57 : vector<1x64xf32> to vector<2x64xf32>
    %59 = arith.addf %56, %58 : vector<2x64xf32>
    %60 = arith.truncf %59 : vector<2x64xf32> to vector<2x64xbf16>
    %c0_50 = arith.constant 0 : index
    %c0_51 = arith.constant 0 : index
    %61 = vector.load %arg21[%c0_50, %c0_51] : memref<64x128xbf16, #tpu.memory_space<vmem>>, vector<64x128xbf16>
    %cst_52 = arith.constant dense<0.000000e+00> : vector<2x128xf32>
    %62 = tpu.matmul %60, %61, %cst_52 {dimension_numbers = #tpu.dot_dimension_numbers<[1], [0], [0], [1], [0, 0, 1, 1], [], []>} : vector<2x64xbf16>, vector<64x128xbf16>, vector<2x128xf32> -> vector<2x128xf32>
    %63 = arith.truncf %37 : vector<2x128xf32> to vector<2x128xbf16>
    %c0_53 = arith.constant 0 : index
    %c0_54 = arith.constant 0 : index
    %64 = vector.load %arg22[%c0_53, %c0_54] : memref<128x128xbf16, #tpu.memory_space<vmem>>, vector<128x128xbf16>
    %cst_55 = arith.constant dense<0.000000e+00> : vector<2x128xf32>
    %65 = tpu.matmul %63, %64, %cst_55 {dimension_numbers = #tpu.dot_dimension_numbers<[1], [0], [0], [1], [0, 0, 1, 1], [], []>} : vector<2x128xbf16>, vector<128x128xbf16>, vector<2x128xf32> -> vector<2x128xf32>
    %66 = arith.addf %62, %65 : vector<2x128xf32>
    %c0_56 = arith.constant 0 : index
    %c0_57 = arith.constant 0 : index
    %67 = vector.load %arg24[%c0_56, %c0_57] : memref<1x128xf32, #tpu.memory_space<vmem>>, vector<1x128xf32>
    %68 = vector.broadcast %67 : vector<1x128xf32> to vector<2x128xf32>
    %69 = arith.addf %66, %68 : vector<2x128xf32>
    %c0_58 = arith.constant 0 : index
    %c0_59 = arith.constant 0 : index
    %70 = vector.load %arg5[%c0_58, %c0_59] : memref<2x16xbf16, #tpu.memory_space<vmem>>, vector<2x16xbf16>
    %c0_60 = arith.constant 0 : index
    %c0_61 = arith.constant 0 : index
    %71 = vector.load %arg23[%c0_60, %c0_61] : memref<16x128xbf16, #tpu.memory_space<vmem>>, vector<16x128xbf16>
    %cst_62 = arith.constant dense<0.000000e+00> : vector<2x128xf32>
    %72 = tpu.matmul %70, %71, %cst_62 {dimension_numbers = #tpu.dot_dimension_numbers<[1], [0], [0], [1], [0, 0, 1, 1], [], []>} : vector<2x16xbf16>, vector<16x128xbf16>, vector<2x128xf32> -> vector<2x128xf32>
    %73 = arith.addf %69, %72 : vector<2x128xf32>
    %cst_63 = arith.constant 0.000000e+00 : f32
    %74 = vector.broadcast %cst_63 : f32 to vector<2x128xf32>
    %75 = arith.maximumf %73, %74 : vector<2x128xf32>
    %c0_64 = arith.constant 0 : index
    %c0_65 = arith.constant 0 : index
    %76 = vector.load %arg25[%c0_64, %c0_65] : memref<1x128xf32, #tpu.memory_space<vmem>>, vector<1x128xf32>
    %77 = vector.broadcast %76 : vector<1x128xf32> to vector<2x128xf32>
    %78 = arith.mulf %75, %77 : vector<2x128xf32>
    %cst_66 = arith.constant dense<0.000000e+00> : vector<2xf32>
    %79 = vector.multi_reduction <add>, %78, %cst_66 [1] : vector<2x128xf32> to vector<2xf32>
    %80 = vector.shape_cast %79 : vector<2xf32> to vector<2x1xf32>
    %c0_67 = arith.constant 0 : index
    %c0_68 = arith.constant 0 : index
    %81 = vector.load %arg26[%c0_67, %c0_68] : memref<1x1xf32, #tpu.memory_space<vmem>>, vector<1x1xf32>
    %82 = vector.broadcast %81 : vector<1x1xf32> to vector<2x1xf32>
    %83 = arith.addf %80, %82 : vector<2x1xf32>
    %84 = arith.truncf %59 : vector<2x64xf32> to vector<2x64xbf16>
    %c0_69 = arith.constant 0 : index
    %c0_70 = arith.constant 0 : index
    %85 = vector.load %arg27[%c0_69, %c0_70] : memref<64x128xbf16, #tpu.memory_space<vmem>>, vector<64x128xbf16>
    %cst_71 = arith.constant dense<0.000000e+00> : vector<2x128xf32>
    %86 = tpu.matmul %84, %85, %cst_71 {dimension_numbers = #tpu.dot_dimension_numbers<[1], [0], [0], [1], [0, 0, 1, 1], [], []>} : vector<2x64xbf16>, vector<64x128xbf16>, vector<2x128xf32> -> vector<2x128xf32>
    %87 = arith.truncf %37 : vector<2x128xf32> to vector<2x128xbf16>
    %c0_72 = arith.constant 0 : index
    %c0_73 = arith.constant 0 : index
    %88 = vector.load %arg28[%c0_72, %c0_73] : memref<128x128xbf16, #tpu.memory_space<vmem>>, vector<128x128xbf16>
    %cst_74 = arith.constant dense<0.000000e+00> : vector<2x128xf32>
    %89 = tpu.matmul %87, %88, %cst_74 {dimension_numbers = #tpu.dot_dimension_numbers<[1], [0], [0], [1], [0, 0, 1, 1], [], []>} : vector<2x128xbf16>, vector<128x128xbf16>, vector<2x128xf32> -> vector<2x128xf32>
    %90 = arith.addf %86, %89 : vector<2x128xf32>
    %c0_75 = arith.constant 0 : index
    %c0_76 = arith.constant 0 : index
    %91 = vector.load %arg29[%c0_75, %c0_76] : memref<1x128xf32, #tpu.memory_space<vmem>>, vector<1x128xf32>
    %92 = vector.broadcast %91 : vector<1x128xf32> to vector<2x128xf32>
    %93 = arith.addf %90, %92 : vector<2x128xf32>
    %cst_77 = arith.constant 0.000000e+00 : f32
    %94 = vector.broadcast %cst_77 : f32 to vector<2x128xf32>
    %95 = arith.maximumf %93, %94 : vector<2x128xf32>
    %c0_78 = arith.constant 0 : index
    %c0_79 = arith.constant 0 : index
    %96 = vector.load %arg30[%c0_78, %c0_79] : memref<1x128xf32, #tpu.memory_space<vmem>>, vector<1x128xf32>
    %97 = vector.broadcast %96 : vector<1x128xf32> to vector<2x128xf32>
    %98 = arith.mulf %95, %97 : vector<2x128xf32>
    %cst_80 = arith.constant dense<0.000000e+00> : vector<2xf32>
    %99 = vector.multi_reduction <add>, %98, %cst_80 [1] : vector<2x128xf32> to vector<2xf32>
    %100 = vector.shape_cast %99 : vector<2xf32> to vector<2x1xf32>
    %c0_81 = arith.constant 0 : index
    %c0_82 = arith.constant 0 : index
    %101 = vector.load %arg31[%c0_81, %c0_82] : memref<1x1xf32, #tpu.memory_space<vmem>>, vector<1x1xf32>
    %102 = vector.broadcast %101 : vector<1x1xf32> to vector<2x1xf32>
    %103 = arith.addf %100, %102 : vector<2x1xf32>
    %104 = arith.truncf %59 : vector<2x64xf32> to vector<2x64xbf16>
    %c0_83 = arith.constant 0 : index
    %c0_84 = arith.constant 0 : index
    %105 = vector.load %arg32[%c0_83, %c0_84] : memref<64x128xbf16, #tpu.memory_space<vmem>>, vector<64x128xbf16>
    %cst_85 = arith.constant dense<0.000000e+00> : vector<2x128xf32>
    %106 = tpu.matmul %104, %105, %cst_85 {dimension_numbers = #tpu.dot_dimension_numbers<[1], [0], [0], [1], [0, 0, 1, 1], [], []>} : vector<2x64xbf16>, vector<64x128xbf16>, vector<2x128xf32> -> vector<2x128xf32>
    %107 = arith.truncf %19 : vector<2x128xf32> to vector<2x128xbf16>
    %c0_86 = arith.constant 0 : index
    %c0_87 = arith.constant 0 : index
    %108 = vector.load %arg33[%c0_86, %c0_87] : memref<128x128xbf16, #tpu.memory_space<vmem>>, vector<128x128xbf16>
    %cst_88 = arith.constant dense<0.000000e+00> : vector<2x128xf32>
    %109 = tpu.matmul %107, %108, %cst_88 {dimension_numbers = #tpu.dot_dimension_numbers<[1], [0], [0], [1], [0, 0, 1, 1], [], []>} : vector<2x128xbf16>, vector<128x128xbf16>, vector<2x128xf32> -> vector<2x128xf32>
    %110 = arith.addf %106, %109 : vector<2x128xf32>
    %111 = arith.truncf %37 : vector<2x128xf32> to vector<2x128xbf16>
    %c0_89 = arith.constant 0 : index
    %c0_90 = arith.constant 0 : index
    %112 = vector.load %arg34[%c0_89, %c0_90] : memref<128x128xbf16, #tpu.memory_space<vmem>>, vector<128x128xbf16>
    %cst_91 = arith.constant dense<0.000000e+00> : vector<2x128xf32>
    %113 = tpu.matmul %111, %112, %cst_91 {dimension_numbers = #tpu.dot_dimension_numbers<[1], [0], [0], [1], [0, 0, 1, 1], [], []>} : vector<2x128xbf16>, vector<128x128xbf16>, vector<2x128xf32> -> vector<2x128xf32>
    %114 = arith.addf %110, %113 : vector<2x128xf32>
    %c0_92 = arith.constant 0 : index
    %c0_93 = arith.constant 0 : index
    %115 = vector.load %arg35[%c0_92, %c0_93] : memref<1x128xf32, #tpu.memory_space<vmem>>, vector<1x128xf32>
    %116 = vector.broadcast %115 : vector<1x128xf32> to vector<2x128xf32>
    %117 = arith.addf %114, %116 : vector<2x128xf32>
    %cst_94 = arith.constant 0.000000e+00 : f32
    %118 = vector.broadcast %cst_94 : f32 to vector<2x128xf32>
    %119 = arith.maximumf %117, %118 : vector<2x128xf32>
    %120 = arith.truncf %119 : vector<2x128xf32> to vector<2x128xbf16>
    %c0_95 = arith.constant 0 : index
    %c0_96 = arith.constant 0 : index
    %121 = vector.load %arg36[%c0_95, %c0_96] : memref<128x16xbf16, #tpu.memory_space<vmem>>, vector<128x16xbf16>
    %cst_97 = arith.constant dense<0.000000e+00> : vector<2x16xf32>
    %122 = tpu.matmul %120, %121, %cst_97 {dimension_numbers = #tpu.dot_dimension_numbers<[1], [0], [0], [1], [0, 0, 1, 1], [], []>} : vector<2x128xbf16>, vector<128x16xbf16>, vector<2x16xf32> -> vector<2x16xf32>
    %c0_98 = arith.constant 0 : index
    %c0_99 = arith.constant 0 : index
    %123 = vector.load %arg37[%c0_98, %c0_99] : memref<1x16xf32, #tpu.memory_space<vmem>>, vector<1x16xf32>
    %124 = vector.broadcast %123 : vector<1x16xf32> to vector<2x16xf32>
    %125 = arith.addf %122, %124 : vector<2x16xf32>
    %c0_100 = arith.constant 0 : index
    %c0_101 = arith.constant 0 : index
    %126 = vector.load %arg6[%c0_100, %c0_101] : memref<256x16xbf16, #tpu.memory_space<vmem>>, vector<256x16xbf16>
    %c0_102 = arith.constant 0 : index
    %c0_103 = arith.constant 0 : index
    %127 = vector.load %arg23[%c0_102, %c0_103] : memref<16x128xbf16, #tpu.memory_space<vmem>>, vector<16x128xbf16>
    %cst_104 = arith.constant dense<0.000000e+00> : vector<256x128xf32>
    %128 = tpu.matmul %126, %127, %cst_104 {dimension_numbers = #tpu.dot_dimension_numbers<[1], [0], [0], [1], [0, 0, 1, 1], [], []>} : vector<256x16xbf16>, vector<16x128xbf16>, vector<256x128xf32> -> vector<256x128xf32>
    %129 = vector.shape_cast %128 : vector<256x128xf32> to vector<2x128x128xf32>
    %130 = vector.shape_cast %69 : vector<2x128xf32> to vector<2x1x128xf32>
    %131 = vector.broadcast %130 : vector<2x1x128xf32> to vector<2x128x128xf32>
    %132 = arith.addf %129, %131 : vector<2x128x128xf32>
    %cst_105 = arith.constant 0.000000e+00 : f32
    %133 = vector.broadcast %cst_105 : f32 to vector<2x128x128xf32>
    %134 = arith.maximumf %132, %133 : vector<2x128x128xf32>
    %c0_106 = arith.constant 0 : index
    %c0_107 = arith.constant 0 : index
    %135 = vector.load %arg25[%c0_106, %c0_107] : memref<1x128xf32, #tpu.memory_space<vmem>>, vector<1x128xf32>
    %136 = vector.shape_cast %135 : vector<1x128xf32> to vector<1x1x128xf32>
    %137 = vector.broadcast %136 : vector<1x1x128xf32> to vector<2x128x128xf32>
    %138 = arith.mulf %134, %137 : vector<2x128x128xf32>
    %cst_108 = arith.constant dense<0.000000e+00> : vector<2x128xf32>
    %139 = vector.multi_reduction <add>, %138, %cst_108 [2] : vector<2x128x128xf32> to vector<2x128xf32>
    %140 = tpu.iota {dimensions = array<i32: 1>} : vector<2x128xi32>
    %c100_i32 = arith.constant 100 : i32
    %141 = vector.broadcast %c100_i32 : i32 to vector<2x128xi32>
    %142 = arith.cmpi slt, %140, %141 : vector<2x128xi32>
    %cst_109 = arith.constant 0xFF800000 : f32
    %143 = vector.broadcast %cst_109 : f32 to vector<2x128xf32>
    %144 = arith.select %142, %139, %143 : vector<2x128xi1>, vector<2x128xf32>
    %cst_110 = arith.constant dense<0xFF800000> : vector<2xf32>
    %145 = vector.multi_reduction <maximumf>, %144, %cst_110 [1] : vector<2x128xf32> to vector<2xf32>
    %146 = vector.shape_cast %145 : vector<2xf32> to vector<2x1xf32>
    %c0_111 = arith.constant 0 : index
    %c0_112 = arith.constant 0 : index
    %147 = vector.load %arg26[%c0_111, %c0_112] : memref<1x1xf32, #tpu.memory_space<vmem>>, vector<1x1xf32>
    %148 = vector.broadcast %147 : vector<1x1xf32> to vector<2x1xf32>
    %149 = arith.addf %146, %148 : vector<2x1xf32>
    %cst_113 = arith.constant 0.000000e+00 : f32
    %150 = vector.broadcast %cst_113 : f32 to vector<2x109xf32>
    %151 = tpu.concatenate %125, %83, %103, %149, %150 in 1 : vector<2x16xf32>, vector<2x1xf32>, vector<2x1xf32>, vector<2x1xf32>, vector<2x109xf32> -> vector<2x128xf32>
    %c0_114 = arith.constant 0 : index
    %c0_115 = arith.constant 0 : index
    %152 = vector.load %arg38[%c0_114, %c0_115] : memref<2x128xf32, #tpu.memory_space<vmem>>, vector<2x128xf32>
    tpu.vector_store %arg38[%c0_114, %c0_115], %151 {strides = array<i32>} : memref<2x128xf32, #tpu.memory_space<vmem>>, vector<2x128xf32>,
    return
  }
  func.func @transform_0(%arg0: i32) -> (i32, i32) {
    %c0_i32 = arith.constant 0 : i32
    %c0_i32_0 = arith.constant 0 : i32
    %c0_i32_1 = arith.constant 0 : i32
    return %c0_i32, %c0_i32_0 : i32, i32
  }
  func.func @transform_1(%arg0: i32) -> (i32, i32) {
    %c0_i32 = arith.constant 0 : i32
    %c0_i32_0 = arith.constant 0 : i32
    %c0_i32_1 = arith.constant 0 : i32
    return %c0_i32, %c0_i32_0 : i32, i32
  }
  func.func @transform_2(%arg0: i32) -> (i32, i32) {
    %c0_i32 = arith.constant 0 : i32
    %c0_i32_0 = arith.constant 0 : i32
    %c0_i32_1 = arith.constant 0 : i32
    return %c0_i32, %c0_i32_0 : i32, i32
  }
  func.func @transform_3(%arg0: i32) -> (i32, i32) {
    %c0_i32 = arith.constant 0 : i32
    %c0_i32_0 = arith.constant 0 : i32
    %c0_i32_1 = arith.constant 0 : i32
    return %c0_i32, %c0_i32_0 : i32, i32
  }
  func.func @transform_4(%arg0: i32) -> (i32, i32) {
    %c0_i32 = arith.constant 0 : i32
    %c0_i32_0 = arith.constant 0 : i32
    %c0_i32_1 = arith.constant 0 : i32
    return %c0_i32, %c0_i32_0 : i32, i32
  }
  func.func @transform_5(%arg0: i32) -> (i32, i32) {
    %c0_i32 = arith.constant 0 : i32
    %c0_i32_0 = arith.constant 0 : i32
    %c0_i32_1 = arith.constant 0 : i32
    return %c0_i32, %c0_i32_0 : i32, i32
  }
  func.func @transform_6(%arg0: i32) -> (i32, i32) {
    %c0_i32 = arith.constant 0 : i32
    %c0_i32_0 = arith.constant 0 : i32
    %c0_i32_1 = arith.constant 0 : i32
    return %c0_i32, %c0_i32_0 : i32, i32
  }
  func.func @transform_7(%arg0: i32) -> (i32, i32) {
    %c0_i32 = arith.constant 0 : i32
    %c0_i32_0 = arith.constant 0 : i32
    %c0_i32_1 = arith.constant 0 : i32
    return %c0_i32, %c0_i32_0 : i32, i32
  }
  func.func @transform_8(%arg0: i32) -> (i32, i32) {
    %c0_i32 = arith.constant 0 : i32
    %c0_i32_0 = arith.constant 0 : i32
    %c0_i32_1 = arith.constant 0 : i32
    return %c0_i32, %c0_i32_0 : i32, i32
  }
  func.func @transform_9(%arg0: i32) -> (i32, i32) {
    %c0_i32 = arith.constant 0 : i32
    %c0_i32_0 = arith.constant 0 : i32
    %c0_i32_1 = arith.constant 0 : i32
    return %c0_i32, %c0_i32_0 : i32, i32
  }
  func.func @transform_10(%arg0: i32) -> (i32, i32) {
    %c0_i32 = arith.constant 0 : i32
    %c0_i32_0 = arith.constant 0 : i32
    %c0_i32_1 = arith.constant 0 : i32
    return %c0_i32, %c0_i32_0 : i32, i32
  }
  func.func @transform_11(%arg0: i32) -> (i32, i32) {
    %c0_i32 = arith.constant 0 : i32
    %c0_i32_0 = arith.constant 0 : i32
    %c0_i32_1 = arith.constant 0 : i32
    return %c0_i32, %c0_i32_0 : i32, i32
  }
  func.func @transform_12(%arg0: i32) -> (i32, i32) {
    %c0_i32 = arith.constant 0 : i32
    %c0_i32_0 = arith.constant 0 : i32
    %c0_i32_1 = arith.constant 0 : i32
    return %c0_i32, %c0_i32_0 : i32, i32
  }
  func.func @transform_13(%arg0: i32) -> (i32, i32) {
    %c0_i32 = arith.constant 0 : i32
    %c0_i32_0 = arith.constant 0 : i32
    %c0_i32_1 = arith.constant 0 : i32
    return %c0_i32, %c0_i32_0 : i32, i32
  }
  func.func @transform_14(%arg0: i32) -> (i32, i32) {
    %c0_i32 = arith.constant 0 : i32
    %c0_i32_0 = arith.constant 0 : i32
    %c0_i32_1 = arith.constant 0 : i32
    return %c0_i32, %c0_i32_0 : i32, i32
  }
  func.func @transform_15(%arg0: i32) -> (i32, i32) {
    %c0_i32 = arith.constant 0 : i32
    %c0_i32_0 = arith.constant 0 : i32
    %c0_i32_1 = arith.constant 0 : i32
    return %c0_i32, %c0_i32_0 : i32, i32
  }
  func.func @transform_16(%arg0: i32) -> (i32, i32) {
    %c0_i32 = arith.constant 0 : i32
    %c0_i32_0 = arith.constant 0 : i32
    %c0_i32_1 = arith.constant 0 : i32
    return %c0_i32, %c0_i32_0 : i32, i32
  }
  func.func @transform_17(%arg0: i32) -> (i32, i32) {
    %c0_i32 = arith.constant 0 : i32
    %c0_i32_0 = arith.constant 0 : i32
    %c0_i32_1 = arith.constant 0 : i32
    return %c0_i32, %c0_i32_0 : i32, i32
  }
  func.func @transform_18(%arg0: i32) -> (i32, i32) {
    %c0_i32 = arith.constant 0 : i32
    %c0_i32_0 = arith.constant 0 : i32
    %c0_i32_1 = arith.constant 0 : i32
    return %c0_i32, %c0_i32_0 : i32, i32
  }
  func.func @transform_19(%arg0: i32) -> (i32, i32) {
    %c0_i32 = arith.constant 0 : i32
    %c0_i32_0 = arith.constant 0 : i32
    %c0_i32_1 = arith.constant 0 : i32
    return %c0_i32, %c0_i32_0 : i32, i32
  }
  func.func @transform_20(%arg0: i32) -> (i32, i32) {
    %c0_i32 = arith.constant 0 : i32
    %c0_i32_0 = arith.constant 0 : i32
    %c0_i32_1 = arith.constant 0 : i32
    return %c0_i32, %c0_i32_0 : i32, i32
  }
  func.func @transform_21(%arg0: i32) -> (i32, i32) {
    %c0_i32 = arith.constant 0 : i32
    %c0_i32_0 = arith.constant 0 : i32
    %c0_i32_1 = arith.constant 0 : i32
    return %c0_i32, %c0_i32_0 : i32, i32
  }
  func.func @transform_22(%arg0: i32) -> (i32, i32) {
    %c0_i32 = arith.constant 0 : i32
    %c0_i32_0 = arith.constant 0 : i32
    %c0_i32_1 = arith.constant 0 : i32
    return %c0_i32, %c0_i32_0 : i32, i32
  }
  func.func @transform_23(%arg0: i32) -> (i32, i32) {
    %c0_i32 = arith.constant 0 : i32
    %c0_i32_0 = arith.constant 0 : i32
    %c0_i32_1 = arith.constant 0 : i32
    return %c0_i32, %c0_i32_0 : i32, i32
  }
  func.func @transform_24(%arg0: i32) -> (i32, i32) {
    %c0_i32 = arith.constant 0 : i32
    %c0_i32_0 = arith.constant 0 : i32
    %c0_i32_1 = arith.constant 0 : i32
    return %c0_i32, %c0_i32_0 : i32, i32
  }
  func.func @transform_25(%arg0: i32) -> (i32, i32) {
    %c0_i32 = arith.constant 0 : i32
    %c0_i32_0 = arith.constant 0 : i32
    %c0_i32_1 = arith.constant 0 : i32
    return %c0_i32, %c0_i32_0 : i32, i32
  }
  func.func @transform_26(%arg0: i32) -> (i32, i32) {
    %c0_i32 = arith.constant 0 : i32
    %c0_i32_0 = arith.constant 0 : i32
    %c0_i32_1 = arith.constant 0 : i32
    return %c0_i32, %c0_i32_0 : i32, i32
  }
  func.func @transform_27(%arg0: i32) -> (i32, i32) {
    %c0_i32 = arith.constant 0 : i32
    %c0_i32_0 = arith.constant 0 : i32
    %c0_i32_1 = arith.constant 0 : i32
    return %c0_i32, %c0_i32_0 : i32, i32
  }
  func.func @transform_28(%arg0: i32) -> (i32, i32) {
    %c0_i32 = arith.constant 0 : i32
    %c0_i32_0 = arith.constant 0 : i32
    %c0_i32_1 = arith.constant 0 : i32
    return %c0_i32, %c0_i32_0 : i32, i32
  }
  func.func @transform_29(%arg0: i32) -> (i32, i32) {
    %c0_i32 = arith.constant 0 : i32
    %c0_i32_0 = arith.constant 0 : i32
    %c0_i32_1 = arith.constant 0 : i32
    return %c0_i32, %c0_i32_0 : i32, i32
  }
  func.func @transform_30(%arg0: i32) -> (i32, i32) {
    %c0_i32 = arith.constant 0 : i32
    %c0_i32_0 = arith.constant 0 : i32
    %c0_i32_1 = arith.constant 0 : i32
    return %c0_i32, %c0_i32_0 : i32, i32
  }
  func.func @transform_31(%arg0: i32) -> (i32, i32) {
    %c0_i32 = arith.constant 0 : i32
    %c0_i32_0 = arith.constant 0 : i32
    %c0_i32_1 = arith.constant 0 : i32
    return %c0_i32, %c0_i32_0 : i32, i32
  }
  func.func @transform_32(%arg0: i32) -> (i32, i32) {
    %c0_i32 = arith.constant 0 : i32
    %c0_i32_0 = arith.constant 0 : i32
    %c0_i32_1 = arith.constant 0 : i32
    return %c0_i32, %c0_i32_0 : i32, i32
  }
  func.func @transform_33(%arg0: i32) -> (i32, i32) {
    %c0_i32 = arith.constant 0 : i32
    %c0_i32_0 = arith.constant 0 : i32
    %c0_i32_1 = arith.constant 0 : i32
    return %c0_i32, %c0_i32_0 : i32, i32
  }
  func.func @transform_34(%arg0: i32) -> (i32, i32) {
    %c0_i32 = arith.constant 0 : i32
    %c0_i32_0 = arith.constant 0 : i32
    %c0_i32_1 = arith.constant 0 : i32
    return %c0_i32, %c0_i32_0 : i32, i32
  }
  func.func @transform_35(%arg0: i32) -> (i32, i32) {
    %c0_i32 = arith.constant 0 : i32
    %c0_i32_0 = arith.constant 0 : i32
    %c0_i32_1 = arith.constant 0 : i32
    return %c0_i32, %c0_i32_0 : i32, i32
  }
  func.func @transform_36(%arg0: i32) -> (i32, i32) {
    %c0_i32 = arith.constant 0 : i32
    %c0_i32_0 = arith.constant 0 : i32
    %c0_i32_1 = arith.constant 0 : i32
    return %c0_i32, %c0_i32_0 : i32, i32
  }
  func.func @transform_37(%arg0: i32) -> (i32, i32) {
    %c0_i32 = arith.constant 0 : i32
    %c0_i32_0 = arith.constant 0 : i32
    %c0_i32_1 = arith.constant 0 : i32
    return %c0_i32, %c0_i32_0 : i32, i32
  }
}

</mosaic_0001>

<bundles_post_ra>
// kernel: wrapper_forward.3
= control target key start
LH: loop header
LB: loop body
LE: loop exit
PB: predicated region body
PF: predicated region fallthrough
CT: control target
= control target key end

     0   :  { %s4433_s3 = smov 6   ;;  %vm398_vm0 = vcmask 130048   ;;  %s4434_s10 = smov 7   ;;  %vm4437_vm1 = vmmov 0   ;;  %vm1146_vm2 = vcmask 1043456   ;;  %vm1004_vm3 = vcmask 1041409   ;;  %s5339_s0 = inlined_call_operand.smem [shape: u32[38], index: -1, kind: input, shape index: {}] }
   0x1   :  { %s3488_s6 = sld [smem:[%s5339_s0 + %s4433_s3]]   ;;  %s4435_s14 = smov 8   ;;  %vm1121_vm4 = vcmask 64512   ;;  %vm1310_vm5 = vcmask 523264   ;;  %vm1508_vm6 = vcmask 261120   ;;  %vm2097_vm7 = vcmask 1041408  }
   0x2   :  { %s4484_s9 = sld [smem:[%s5339_s0]]   ;;  %s4438_s18 = smov 10   ;;  %vm3273_vm8 = vcmask 130112   ;;  %vm3280_vm9 = vcmask 195712   ;;  %vm3287_vm10 = vcmask 261312   ;;  %vm3294_vm11 = vcmask 326912  }
   0x3   :  { %s3489_s13 = sld [smem:[%s5339_s0 + %s4434_s10]]   ;;  %s4439_s22 = smov 1   ;;  %vm3301_vm12 = vcmask 392512   ;;  %vm3308_vm13 = vcmask 458112   ;;  %vm3315_vm14 = vcmask 523712   ;;  %vm3322_vm15 = vcmask 589312  }
   0x4   :  { %s3490_s17 = sld [smem:[%s5339_s0 + %s4435_s14]]   ;;  %s4440_s26 = smov 12  }
   0x5   :  { %s3492_s21 = sld [smem:[%s5339_s0 + %s4438_s18]]   ;;  %s4441_s30 = smov 15  }
   0x6   :  { %s4603_s25 = sld [smem:[%s5339_s0 + %s4439_s22]]   ;;  %s4442_s4 = smov 14  }
   0x7   :  { %v4296_v0 = vld [vmem:[%s3488_s6] sm:$0xff]   ;;  %s4671_s29 = sld [smem:[%s5339_s0 + %s4440_s26]]   ;;  %s4443_s8 = smov 16  }
   0x8   :  { %v4297_v1 = vld [vmem:[%s4484_s9] sm:$0xff]   ;;  %3903 = vmatprep.subr.bf16.mxu0 %v4296_v0  ;;  %v4298_v2 = vld [vmem:[%s4484_s9 + $0x8] sm:$0xff]   ;;  %4253 = vmatprep.subr.bf16.mxu1 %v4296_v0  ;;  %v4299_v3 = vld [vmem:[%s4484_s9 + $0x10] sm:$0xff]   ;;  %s4788_s3 = sld [smem:[%s5339_s0 + %s4441_s30]]   ;;  %s4444_s12 = smov 18  }
   0x9   :  { %3904 = vmatpush3.bf16.msra.mxu0 %v4296_v0  ;;  %3905 = vmatprep.mubr.msk.bf16.mxu0 %vm398_vm0, %v4297_v1  ;;  %v4300_v4 = vld [vmem:[%s4484_s9 + $0x18] sm:$0xff]   ;;  %v4301_v5 = vld [vmem:[%s4484_s9 + $0x20] sm:$0xff]   ;;  %v4302_v6 = vld [vmem:[%s4484_s9 + $0x28] sm:$0xff]   ;;  %s4793_s7 = sld [smem:[%s5339_s0 + %s4442_s4]]   ;;  %s4445_s16 = smov 11  }
   0xa   :  { %4254 = vmatpush3.bf16.msra.mxu1 %v4296_v0  ;;  %v4303_v7 = vld [vmem:[%s4484_s9 + $0x30] sm:$0xff]   ;;  %v4304_v8 = vld [vmem:[%s4484_s9 + $0x38] sm:$0xff]   ;;  %v4305_v9 = vld [vmem:[%s4484_s9 + $0x40] sm:$0xff]   ;;  %s4799_s11 = sld [smem:[%s5339_s0 + %s4443_s8]]   ;;  %s4446_s20 = smov 2  }
   0xb   :  { %v4321_v10 = vld [vmem:[%s4484_s9 + $0xc0] sm:$0xff]   ;;  %v4322_v11 = vld [vmem:[%s4484_s9 + $0xc8] sm:$0xff]   ;;  %v4323_v12 = vld [vmem:[%s4484_s9 + $0xd0] sm:$0xff]   ;;  %s4805_s15 = sld [smem:[%s5339_s0 + %s4444_s12]]   ;;  %s4447_s24 = smov 9  }
   0xc   :  { %3906 = vmatmul.mubr.msk.bf16.vlgmr.msra.gmra.mrb[0].mxu0 %vm398_vm0, %v4298_v2  ;;  %3953 = vmatprep.mubr.msk.bf16.mxu1 %vm398_vm0, %v4321_v10  ;;  %v4324_v13 = vld [vmem:[%s4484_s9 + $0xd8] sm:$0xff]   ;;  %v4325_v14 = vld [vmem:[%s4484_s9 + $0xe0] sm:$0xff]   ;;  %v4306_v15 = vld [vmem:[%s4484_s9 + $0x48] sm:$0xff]   ;;  %s3493_s19 = sld [smem:[%s5339_s0 + %s4445_s16]]   ;;  %s4448_s28 = smov 3  }
   0xd   :  { %3909 = vmatprep.mubr.msk.bf16.mxu0 %vm398_vm0, %v4299_v3  ;;  %3954 = vmatmul.mubr.msk.bf16.vlgmr.msra.gmra.mrb[0].mxu1 %vm398_vm0, %v4322_v11  ;;  %v4307_v16 = vld [vmem:[%s4484_s9 + $0x50] sm:$0xff]   ;;  %v4326_v17 = vld [vmem:[%s4484_s9 + $0xe8] sm:$0xff]   ;;  %v4308_v19 = vld [vmem:[%s4484_s9 + $0x58] sm:$0xff]   ;;  %s3484_s23 = sld [smem:[%s5339_s0 + %s4446_s20]]   ;;  %s4449_s2 = smov 21  }
   0xe   :  { %3957 = vmatprep.mubr.msk.bf16.mxu1 %vm398_vm0, %v4323_v12  ;;  %v4327_v18 = vld [vmem:[%s4484_s9 + $0xf0] sm:$0xff]   ;;  %v4309_v20 = vld [vmem:[%s4484_s9 + $0x60] sm:$0xff]   ;;  %v4328_v21 = vld [vmem:[%s4484_s9 + $0xf8] sm:$0xff]   ;;  %s3491_s27 = sld [smem:[%s5339_s0 + %s4447_s24]]   ;;  %s4450_s6 = smov 13  }
   0xf   :  { %v4310_v22 = vld [vmem:[%s4484_s9 + $0x68] sm:$0xff]   ;;  %v4311_v23 = vld [vmem:[%s4484_s9 + $0x70] sm:$0xff]   ;;  %v4312_v24 = vld [vmem:[%s4484_s9 + $0x78] sm:$0xff]   ;;  %s3485_s1 = sld [smem:[%s5339_s0 + %s4448_s28]]   ;;  %s4452_s16 = smov 26  }
  0x10   :  { %v4313_v25 = vld [vmem:[%s4484_s9 + $0x80] sm:$0xff]   ;;  %v4314_v26 = vld [vmem:[%s4484_s9 + $0x88] sm:$0xff]   ;;  %v4315_v27 = vld [vmem:[%s4484_s9 + $0x90] sm:$0xff]   ;;  %s3503_s5 = sld [smem:[%s5339_s0 + %s4449_s2]]   ;;  %s4453_s20 = smov 20  }
  0x11   :  { %v4316_v28 = vld [vmem:[%s4484_s9 + $0x98] sm:$0xff]   ;;  %v4317_v29 = vld [vmem:[%s4484_s9 + $0xa0] sm:$0xff]   ;;  %v4318_v30 = vld [vmem:[%s4484_s9 + $0xa8] sm:$0xff]   ;;  %s3495_s10 = sld [smem:[%s5339_s0 + %s4450_s6]]   ;;  %s4454_s24 = smov 32  }
  0x12   :  { %v4319_v31 = vld [vmem:[%s4484_s9 + $0xb0] sm:$0xff]   ;;  %v4320_v32 = vld [vmem:[%s4484_s9 + $0xb8] sm:$0xff]   ;;  %v4553_v33 = vld [vmem:[%s3489_s13] ss:$0 sm:$0xff]  ;;  %s4455_s28 = smov 22   ;;  %s4456_s2 = smov 27  }
  0x13   :  { %s4457_s6 = smov 31   ;;  %s4458_s13 = smov 33  }
  0x14   :  { %3910 = vmatmul.mubr.msk.bf16.gmra.mrb[4].mxu0 %vm398_vm0, %v4300_v4  ;;  %s4466_s14 = smov 24   ;;  %s4467_s18 = smov 25  }
  0x15   :  { %3913 = vmatprep.mubr.msk.bf16.mxu0 %vm398_vm0, %v4301_v5  ;;  %3958 = vmatmul.mubr.msk.bf16.gmra.mrb[4].mxu1 %vm398_vm0, %v4324_v13  ;;  %s4468_s22 = smov 28   ;;  %s4469_s26 = smov 29  }
  0x16   :  { %3961 = vmatprep.mubr.msk.bf16.mxu1 %vm398_vm0, %v4325_v14  ;;  %s4470_s30 = smov 30  }
  0x1c   :  { %3914 = vmatmul.mubr.msk.bf16.gmra.mrb[8].mxu0 %vm398_vm0, %v4302_v6 }
  0x1d   :  { %3917 = vmatprep.mubr.msk.bf16.mxu0 %vm398_vm0, %v4303_v7  ;;  %3962 = vmatmul.mubr.msk.bf16.gmra.mrb[8].mxu1 %vm398_vm0, %v4326_v17 }
  0x1e   :  { %3965 = vmatprep.mubr.msk.bf16.mxu1 %vm398_vm0, %v4327_v18 }
  0x24   :  { %3918 = vmatmul.mubr.msk.bf16.gmra.mrb[12].mxu0 %vm398_vm0, %v4304_v8 }
  0x25   :  { %3921 = vmatprep.mubr.msk.bf16.mxu0 %vm398_vm0, %v4305_v9  ;;  %3966 = vmatmul.mubr.msk.bf16.gmra.mrb[12].mxu1 %vm398_vm0, %v4328_v21 }
  0x2c   :  { %3922 = vmatmul.mubr.msk.bf16.gmra.mrb[16].mxu0 %vm398_vm0, %v4306_v15 }
  0x2d   :  { %3925 = vmatprep.mubr.msk.bf16.mxu0 %vm398_vm0, %v4307_v16 }
  0x34   :  { %3926 = vmatmul.mubr.msk.bf16.gmra.mrb[20].mxu0 %vm398_vm0, %v4308_v19 }
  0x35   :  { %3929 = vmatprep.mubr.msk.bf16.mxu0 %vm398_vm0, %v4309_v20 }
  0x3c   :  { %3930 = vmatmul.mubr.msk.bf16.gmra.mrb[24].mxu0 %vm398_vm0, %v4310_v22 }
  0x3d   :  { %3933 = vmatprep.mubr.msk.bf16.mxu0 %vm398_vm0, %v4311_v23 }
  0x44   :  { %3934 = vmatmul.mubr.msk.bf16.gmra.mrb[28].mxu0 %vm398_vm0, %v4312_v24 }
  0x45   :  { %3937 = vmatprep.mubr.msk.bf16.mxu0 %vm398_vm0, %v4313_v25  ;;  %v4329_v25 = vld [vmem:[%s3490_s17] sm:$0xff]   ;;  %s4459_s17 = smov 5  }
  0x4c   :  { %3938 = vmatmul.mubr.msk.bf16.gmra.mrb[32].mxu0 %vm398_vm0, %v4314_v26 }
  0x4d   :  { %3941 = vmatprep.mubr.msk.bf16.mxu0 %vm398_vm0, %v4315_v27 }
  0x54   :  { %3942 = vmatmul.mubr.msk.bf16.gmra.mrb[36].mxu0 %vm398_vm0, %v4316_v28 }
  0x55   :  { %3945 = vmatprep.mubr.msk.bf16.mxu0 %vm398_vm0, %v4317_v29  ;;  %v4436_v29 = vmov 0.0  }
  0x56   :  { %3969 = vmatprep.subr.bf16.mxu1 %v4436_v29  ;;  %4057 = vmatprep.subr.bf16.mxu0 %v4436_v29 }
  0x57   :  { %3970 = vmatpush3.bf16.msra.mxu1 %v4329_v25  ;;  %3971 = vmatprep.mubr.msk.bf16.mxu1 %vm4437_vm1, %v4436_v29 }
  0x5c   :  { %3946 = vmatmul.mubr.msk.bf16.gmra.mrb[40].mxu0 %vm398_vm0, %v4318_v30 }
  0x5d   :  { %3949 = vmatprep.mubr.msk.bf16.mxu0 %vm398_vm0, %v4319_v31 }
  0x64   :  { %3950 = vmatmul.mubr.msk.bf16.gmra.mrb[44].mxu0 %vm398_vm0, %v4320_v32 }
  0x65   :  { %4073 = vmatprep.mubr.msk.bf16.mxu0 %vm4437_vm1, %v4436_v29 }
  0xdf   :  { %v3907_v34 = vpop.f32.mrb[0].mxu0 }
  0xe0   :  { %v529_v35 = vpop.f32.mrb[1].mxu0  ;;  %v538_v36 = vadd.f32 %v3907_v34, %v4553_v33  ;;  %v4579_v21 = vpop.f32.mrb[0].mxu1 }
  0xe1   :  { %v530_v37 = vadd.f32 %v4553_v33, %v529_v35  ;;  %v3908_v38 = vpop.f32.mrb[2].mxu0  ;;  %v4581_v24 = vpop.f32.mrb[1].mxu1 }
  0xe2   :  { %v532_v39 = vpop.f32.mrb[3].mxu0  ;;  %v541_v41 = vadd.f32 %v3908_v38, %v4553_v33  ;;  %v786_v43 = vmax.f32 %v538_v36, 0.0  ;;  %v4584_v28 = vpop.f32.mrb[2].mxu1 }
  0xe3   :  { %v784_v40 = vmax.f32 %v530_v37, 0.0  ;;  %v533_v42 = vadd.f32 %v4553_v33, %v532_v39  ;;  %v4588_v32 = vpop.f32.mrb[3].mxu1 }
  0xe4   :  { %v787_v46 = vmax.f32 %v541_v41, 0.0  ;;  %v851_v51 = vsel %vm398_vm0, %v786_v43, 0.0 }
  0xe5   :  { %v785_v44 = vmax.f32 %v533_v42, 0.0  ;;  %v848_v45 = vsel %vm398_vm0, %v784_v40, 0.0 }
  0xe6   :  { %v853_v57 = vsel %vm398_vm0, %v787_v46, 0.0 }
  0xe7   :  { %v849_v47 = vsel %vm398_vm0, %v785_v44, 0.0  ;;  %v3911_v48 = vpop.f32.mrb[4].mxu0 }
  0xe8   :  { %v850_v49 = vadd.f32 %v849_v47, %v848_v45  ;;  %v545_v50 = vpop.f32.mrb[5].mxu0  ;;  %v554_v52 = vadd.f32 %v3911_v48, %v4553_v33  ;;  %v4609_v48 = vpop.f32.mrb[4].mxu1 }
  0xe9   :  { %v546_v53 = vadd.f32 %v4553_v33, %v545_v50  ;;  %v3912_v54 = vpop.f32.mrb[6].mxu0  ;;  %v4611_v50 = vpop.f32.mrb[5].mxu1 }
  0xea   :  { %v852_v55 = vadd.f32 %v851_v51, %v850_v49  ;;  %v548_v56 = vpop.f32.mrb[7].mxu0  ;;  %v557_v59 = vadd.f32 %v3912_v54, %v4553_v33  ;;  %v790_v62 = vmax.f32 %v554_v52, 0.0  ;;  %v4614_v54 = vpop.f32.mrb[6].mxu1 }
  0xeb   :  { %v788_v58 = vmax.f32 %v546_v53, 0.0  ;;  %v549_v60 = vadd.f32 %v4553_v33, %v548_v56 }
  0xec   :  { %v854_v61 = vadd.f32 %v853_v57, %v852_v55  ;;  %v791_v2 = vmax.f32 %v557_v59, 0.0  ;;  %v859_v7 = vsel %vm398_vm0, %v790_v62, 0.0  ;;  %v1073_v55 = vld [vmem:[%s3492_s21] sm:$0xf]  ;;  %s4460_s21 = smov 19  }
  0xed   :  { %v855_v63 = vsel %vm398_vm0, %v788_v58, 0.0  ;;  %v789_v0 = vmax.f32 %v549_v60, 0.0  ;;  %v4616_v58 = vpop.f32.mrb[7].mxu1  ;;  %4255 = vmatprep.subr.msk.bf16.mxu1 %vm1146_vm2, %v1073_v55 }
  0xee   :  { %v856_v1 = vadd.f32 %v855_v63, %v854_v61  ;;  %v861_v14 = vsel %vm398_vm0, %v791_v2, 0.0  ;;  %v4623_v63 = vsel %vm1146_vm2, %v1073_v55, 0  ;;  %vm3336_vm2 = vcmask 720512  }
  0xef   :  { %v857_v3 = vsel %vm398_vm0, %v789_v0, 0.0  ;;  %v3915_v4 = vpop.f32.mrb[8].mxu0 }
  0xf0   :  { %v858_v5 = vadd.f32 %v857_v3, %v856_v1  ;;  %v561_v6 = vpop.f32.mrb[9].mxu0  ;;  %v570_v8 = vadd.f32 %v3915_v4, %v4553_v33 }
  0xf1   :  { %v562_v9 = vadd.f32 %v4553_v33, %v561_v6  ;;  %v3916_v10 = vpop.f32.mrb[10].mxu0 }
  0xf2   :  { %v860_v11 = vadd.f32 %v859_v7, %v858_v5  ;;  %v573_v12 = vadd.f32 %v3916_v10, %v4553_v33  ;;  %v564_v13 = vpop.f32.mrb[11].mxu0  ;;  %v794_v18 = vmax.f32 %v570_v8, 0.0  ;;  %v4629_v10 = vpop.f32.mrb[8].mxu1 }
  0xf3   :  { %v792_v15 = vmax.f32 %v562_v9, 0.0  ;;  %v565_v16 = vadd.f32 %v4553_v33, %v564_v13 }
  0xf4   :  { %v862_v17 = vadd.f32 %v861_v14, %v860_v11  ;;  %v795_v23 = vmax.f32 %v573_v12, 0.0  ;;  %v867_v34 = vsel %vm398_vm0, %v794_v18, 0.0  ;;  %v4631_v12 = vpop.f32.mrb[9].mxu1 }
  0xf5   :  { %v863_v19 = vsel %vm398_vm0, %v792_v15, 0.0  ;;  %v793_v20 = vmax.f32 %v565_v16, 0.0  ;;  %v4634_v16 = vpop.f32.mrb[10].mxu1 }
  0xf6   :  { %v864_v22 = vadd.f32 %v863_v19, %v862_v17  ;;  %v869_v40 = vsel %vm398_vm0, %v795_v23, 0.0  ;;  %v4636_v19 = vpop.f32.mrb[11].mxu1 }
  0xf7   :  { %v865_v26 = vsel %vm398_vm0, %v793_v20, 0.0  ;;  %v3919_v27 = vpop.f32.mrb[12].mxu0 }
  0xf8   :  { %v866_v30 = vadd.f32 %v865_v26, %v864_v22  ;;  %v577_v31 = vpop.f32.mrb[13].mxu0  ;;  %v586_v35 = vadd.f32 %v3919_v27, %v4553_v33 }
  0xf9   :  { %v578_v36 = vadd.f32 %v4553_v33, %v577_v31  ;;  %v3920_v37 = vpop.f32.mrb[14].mxu0 }
  0xfa   :  { %v868_v38 = vadd.f32 %v867_v34, %v866_v30  ;;  %v580_v39 = vpop.f32.mrb[15].mxu0  ;;  %v589_v42 = vadd.f32 %v3920_v37, %v4553_v33  ;;  %v798_v45 = vmax.f32 %v586_v35, 0.0 }
  0xfb   :  { %v796_v41 = vmax.f32 %v578_v36, 0.0  ;;  %v581_v43 = vadd.f32 %v4553_v33, %v580_v39 }
  0xfc   :  { %v870_v44 = vadd.f32 %v869_v40, %v868_v38  ;;  %v799_v51 = vmax.f32 %v589_v42, 0.0  ;;  %v875_v59 = vsel %vm398_vm0, %v798_v45, 0.0  ;;  %v4645_v40 = vpop.f32.mrb[12].mxu1 }
  0xfd   :  { %v871_v46 = vsel %vm398_vm0, %v796_v41, 0.0  ;;  %v797_v47 = vmax.f32 %v581_v43, 0.0  ;;  %v4647_v42 = vpop.f32.mrb[13].mxu1 }
  0xfe   :  { %v872_v49 = vadd.f32 %v871_v46, %v870_v44  ;;  %v877_v2 = vsel %vm398_vm0, %v799_v51, 0.0  ;;  %v4650_v46 = vpop.f32.mrb[14].mxu1 }
  0xff   :  { %v873_v52 = vsel %vm398_vm0, %v797_v47, 0.0  ;;  %v3923_v53 = vpop.f32.mrb[16].mxu0  ;;  %v4652_v51 = vpop.f32.mrb[15].mxu1 }
 0x100   :  { %v874_v56 = vadd.f32 %v873_v52, %v872_v49  ;;  %v593_v57 = vpop.f32.mrb[17].mxu0  ;;  %v602_v60 = vadd.f32 %v3923_v53, %v4553_v33 }
 0x101   :  { %v594_v61 = vadd.f32 %v4553_v33, %v593_v57  ;;  %v3924_v62 = vpop.f32.mrb[18].mxu0 }
 0x102   :  { %v876_v0 = vadd.f32 %v875_v59, %v874_v56  ;;  %v596_v1 = vpop.f32.mrb[19].mxu0  ;;  %v605_v4 = vadd.f32 %v3924_v62, %v4553_v33  ;;  %v802_v7 = vmax.f32 %v602_v60, 0.0 }
 0x103   :  { %v800_v3 = vmax.f32 %v594_v61, 0.0  ;;  %v597_v5 = vadd.f32 %v4553_v33, %v596_v1 }
 0x104   :  { %v878_v6 = vadd.f32 %v877_v2, %v876_v0  ;;  %v803_v13 = vmax.f32 %v605_v4, 0.0  ;;  %v883_v20 = vsel %vm398_vm0, %v802_v7, 0.0 }
 0x105   :  { %v879_v8 = vsel %vm398_vm0, %v800_v3, 0.0  ;;  %v801_v9 = vmax.f32 %v597_v5, 0.0 }
 0x106   :  { %v880_v11 = vadd.f32 %v879_v8, %v878_v6  ;;  %v885_v30 = vsel %vm398_vm0, %v803_v13, 0.0 }
 0x107   :  { %v881_v14 = vsel %vm398_vm0, %v801_v9, 0.0  ;;  %v3927_v15 = vpop.f32.mrb[20].mxu0 }
 0x108   :  { %v882_v17 = vadd.f32 %v881_v14, %v880_v11  ;;  %v609_v18 = vpop.f32.mrb[21].mxu0  ;;  %v618_v22 = vadd.f32 %v3927_v15, %v4553_v33 }
 0x109   :  { %v610_v23 = vadd.f32 %v4553_v33, %v609_v18  ;;  %v3928_v25 = vpop.f32.mrb[22].mxu0 }
 0x10a   :  { %v884_v26 = vadd.f32 %v883_v20, %v882_v17  ;;  %v612_v27 = vpop.f32.mrb[23].mxu0  ;;  %v621_v34 = vadd.f32 %v3928_v25, %v4553_v33  ;;  %v806_v37 = vmax.f32 %v618_v22, 0.0 }
 0x10b   :  { %v804_v31 = vmax.f32 %v610_v23, 0.0  ;;  %v613_v35 = vadd.f32 %v4553_v33, %v612_v27 }
 0x10c   :  { %v886_v36 = vadd.f32 %v885_v30, %v884_v26  ;;  %v807_v43 = vmax.f32 %v621_v34, 0.0  ;;  %v891_v52 = vsel %vm398_vm0, %v806_v37, 0.0 }
 0x10d   :  { %v887_v38 = vsel %vm398_vm0, %v804_v31, 0.0  ;;  %v805_v39 = vmax.f32 %v613_v35, 0.0 }
 0x10e   :  { %v888_v41 = vadd.f32 %v887_v38, %v886_v36  ;;  %v893_v60 = vsel %vm398_vm0, %v807_v43, 0.0 }
 0x10f   :  { %v889_v44 = vsel %vm398_vm0, %v805_v39, 0.0  ;;  %v3931_v45 = vpop.f32.mrb[24].mxu0 }
 0x110   :  { %v890_v47 = vadd.f32 %v889_v44, %v888_v41  ;;  %v625_v49 = vpop.f32.mrb[25].mxu0  ;;  %v634_v53 = vadd.f32 %v3931_v45, %v4553_v33 }
 0x111   :  { %v626_v55 = vadd.f32 %v4553_v33, %v625_v49  ;;  %v3932_v56 = vpop.f32.mrb[26].mxu0 }
 0x112   :  { %v892_v57 = vadd.f32 %v891_v52, %v890_v47  ;;  %v628_v59 = vpop.f32.mrb[27].mxu0  ;;  %v637_v62 = vadd.f32 %v3932_v56, %v4553_v33  ;;  %v810_v2 = vmax.f32 %v634_v53, 0.0 }
 0x113   :  { %v808_v61 = vmax.f32 %v626_v55, 0.0  ;;  %v629_v0 = vadd.f32 %v4553_v33, %v628_v59 }
 0x114   :  { %v894_v1 = vadd.f32 %v893_v60, %v892_v57  ;;  %v811_v6 = vmax.f32 %v637_v62, 0.0  ;;  %v899_v13 = vsel %vm398_vm0, %v810_v2, 0.0 }
 0x115   :  { %v895_v3 = vsel %vm398_vm0, %v808_v61, 0.0  ;;  %v809_v4 = vmax.f32 %v629_v0, 0.0 }
 0x116   :  { %v896_v5 = vadd.f32 %v895_v3, %v894_v1  ;;  %v901_v22 = vsel %vm398_vm0, %v811_v6, 0.0 }
 0x117   :  { %v897_v7 = vsel %vm398_vm0, %v809_v4, 0.0  ;;  %v3935_v8 = vpop.f32.mrb[28].mxu0 }
 0x118   :  { %v898_v9 = vadd.f32 %v897_v7, %v896_v5  ;;  %v641_v11 = vpop.f32.mrb[29].mxu0  ;;  %v650_v14 = vadd.f32 %v3935_v8, %v4553_v33 }
 0x119   :  { %v642_v15 = vadd.f32 %v4553_v33, %v641_v11  ;;  %v3936_v17 = vpop.f32.mrb[30].mxu0 }
 0x11a   :  { %v900_v18 = vadd.f32 %v899_v13, %v898_v9  ;;  %v644_v20 = vpop.f32.mrb[31].mxu0  ;;  %v653_v25 = vadd.f32 %v3936_v17, %v4553_v33  ;;  %v814_v30 = vmax.f32 %v650_v14, 0.0 }
 0x11b   :  { %v812_v23 = vmax.f32 %v642_v15, 0.0  ;;  %v645_v26 = vadd.f32 %v4553_v33, %v644_v20 }
 0x11c   :  { %v902_v27 = vadd.f32 %v901_v22, %v900_v18  ;;  %v815_v36 = vmax.f32 %v653_v25, 0.0  ;;  %v907_v43 = vsel %vm398_vm0, %v814_v30, 0.0 }
 0x11d   :  { %v903_v31 = vsel %vm398_vm0, %v812_v23, 0.0  ;;  %v813_v34 = vmax.f32 %v645_v26, 0.0 }
 0x11e   :  { %v904_v35 = vadd.f32 %v903_v31, %v902_v27  ;;  %v909_v53 = vsel %vm398_vm0, %v815_v36, 0.0 }
 0x11f   :  { %v905_v37 = vsel %vm398_vm0, %v813_v34, 0.0  ;;  %v3939_v38 = vpop.f32.mrb[32].mxu0 }
 0x120   :  { %v906_v39 = vadd.f32 %v905_v37, %v904_v35  ;;  %v657_v41 = vpop.f32.mrb[33].mxu0  ;;  %v666_v44 = vadd.f32 %v3939_v38, %v4553_v33 }
 0x121   :  { %v658_v45 = vadd.f32 %v4553_v33, %v657_v41  ;;  %v3940_v47 = vpop.f32.mrb[34].mxu0 }
 0x122   :  { %v908_v49 = vadd.f32 %v907_v43, %v906_v39  ;;  %v660_v52 = vpop.f32.mrb[35].mxu0  ;;  %v669_v56 = vadd.f32 %v3940_v47, %v4553_v33  ;;  %v818_v60 = vmax.f32 %v666_v44, 0.0 }
 0x123   :  { %v816_v55 = vmax.f32 %v658_v45, 0.0  ;;  %v661_v57 = vadd.f32 %v4553_v33, %v660_v52 }
 0x124   :  { %v4681_v59 = vadd.f32 %v909_v53, %v908_v49  ;;  %v819_v0 = vmax.f32 %v669_v56, 0.0  ;;  %v920_v5 = vsel %vm398_vm0, %v818_v60, 0.0 }
 0x125   :  { %v817_v61 = vmax.f32 %v661_v57, 0.0  ;;  %v917_v62 = vsel %vm398_vm0, %v816_v55, 0.0 }
 0x126   :  { %v922_v13 = vsel %vm398_vm0, %v819_v0, 0.0 }
 0x127   :  { %v918_v1 = vsel %vm398_vm0, %v817_v61, 0.0  ;;  %v3943_v2 = vpop.f32.mrb[36].mxu0 }
 0x128   :  { %v919_v3 = vadd.f32 %v918_v1, %v917_v62  ;;  %v673_v4 = vpop.f32.mrb[37].mxu0  ;;  %v682_v6 = vadd.f32 %v3943_v2, %v4553_v33 }
 0x129   :  { %v674_v7 = vadd.f32 %v4553_v33, %v673_v4  ;;  %v3944_v8 = vpop.f32.mrb[38].mxu0 }
 0x12a   :  { %v921_v9 = vadd.f32 %v920_v5, %v919_v3  ;;  %v676_v11 = vpop.f32.mrb[39].mxu0  ;;  %v685_v15 = vadd.f32 %v3944_v8, %v4553_v33  ;;  %v822_v20 = vmax.f32 %v682_v6, 0.0 }
 0x12b   :  { %v820_v14 = vmax.f32 %v674_v7, 0.0  ;;  %v677_v17 = vadd.f32 %v4553_v33, %v676_v11  ;;  %v722_v7 = vadd.f32 %v4553_v33, %v4581_v24  ;;  %v725_v24 = vadd.f32 %v4553_v33, %v4588_v32 }
 0x12c   :  { %v923_v18 = vadd.f32 %v922_v13, %v921_v9  ;;  %v823_v26 = vmax.f32 %v685_v15, 0.0  ;;  %v928_v35 = vsel %vm398_vm0, %v822_v20, 0.0 }
 0x12d   :  { %v924_v22 = vsel %vm398_vm0, %v820_v14, 0.0  ;;  %v821_v23 = vmax.f32 %v677_v17, 0.0 }
 0x12e   :  { %v925_v25 = vadd.f32 %v924_v22, %v923_v18  ;;  %v930_v43 = vsel %vm398_vm0, %v823_v26, 0.0 }
 0x12f   :  { %v926_v27 = vsel %vm398_vm0, %v821_v23, 0.0  ;;  %v3947_v30 = vpop.f32.mrb[40].mxu0 }
 0x130   :  { %v927_v31 = vadd.f32 %v926_v27, %v925_v25  ;;  %v689_v34 = vpop.f32.mrb[41].mxu0  ;;  %v698_v36 = vadd.f32 %v3947_v30, %v4553_v33  ;;  %v832_v25 = vmax.f32 %v722_v7, 0.0  ;;  %v730_v30 = vadd.f32 %v4579_v21, %v4553_v33 }
 0x131   :  { %v690_v37 = vadd.f32 %v4553_v33, %v689_v34  ;;  %v3948_v38 = vpop.f32.mrb[42].mxu0  ;;  %v733_v34 = vadd.f32 %v4584_v28, %v4553_v33  ;;  %v741_v21 = vadd.f32 %v4553_v33, %v4616_v58 }
 0x132   :  { %v929_v39 = vadd.f32 %v928_v35, %v927_v31  ;;  %v692_v41 = vpop.f32.mrb[43].mxu0  ;;  %v701_v45 = vadd.f32 %v3948_v38, %v4553_v33  ;;  %v826_v52 = vmax.f32 %v698_v36, 0.0  ;;  %v948_v36 = vsel %vm398_vm0, %v832_v25, 0.0 }
 0x133   :  { %v824_v44 = vmax.f32 %v690_v37, 0.0  ;;  %v693_v47 = vadd.f32 %v4553_v33, %v692_v41  ;;  %v833_v37 = vmax.f32 %v725_v24, 0.0  ;;  %v738_v38 = vadd.f32 %v4553_v33, %v4611_v50 }
 0x134   :  { %v931_v49 = vadd.f32 %v930_v43, %v929_v39  ;;  %v827_v57 = vmax.f32 %v701_v45, 0.0  ;;  %v936_v1 = vsel %vm398_vm0, %v826_v52, 0.0  ;;  %v834_v32 = vmax.f32 %v730_v30, 0.0 }
 0x135   :  { %v932_v53 = vsel %vm398_vm0, %v824_v44, 0.0  ;;  %v825_v55 = vmax.f32 %v693_v47, 0.0  ;;  %v835_v43 = vmax.f32 %v733_v34, 0.0  ;;  %v950_v44 = vsel %vm398_vm0, %v833_v37, 0.0 }
 0x136   :  { %v933_v56 = vadd.f32 %v932_v53, %v931_v49  ;;  %v938_v8 = vsel %vm398_vm0, %v827_v57, 0.0  ;;  %v836_v45 = vmax.f32 %v738_v38, 0.0  ;;  %v952_v28 = vsel %vm398_vm0, %v834_v32, 0.0 }
 0x137   :  { %v934_v60 = vsel %vm398_vm0, %v825_v55, 0.0  ;;  %v3951_v61 = vpop.f32.mrb[44].mxu0  ;;  %v746_v49 = vadd.f32 %v4609_v48, %v4553_v33  ;;  %v749_v50 = vadd.f32 %v4614_v54, %v4553_v33  ;;  %v954_v53 = vsel %vm398_vm0, %v835_v43, 0.0 }
 0x138   :  { %v935_v62 = vadd.f32 %v934_v60, %v933_v56  ;;  %v705_v0 = vpop.f32.mrb[45].mxu0  ;;  %v714_v2 = vadd.f32 %v3951_v61, %v4553_v33  ;;  %v956_v55 = vsel %vm398_vm0, %v836_v45, 0.0  ;;  %v837_v56 = vmax.f32 %v741_v21, 0.0 }
 0x139   :  { %v706_v3 = vadd.f32 %v4553_v33, %v705_v0  ;;  %v3952_v4 = vpop.f32.mrb[46].mxu0  ;;  %v754_v57 = vadd.f32 %v4553_v33, %v4631_v12  ;;  %v838_v58 = vmax.f32 %v746_v49, 0.0  ;;  %v757_v48 = vadd.f32 %v4553_v33, %v4636_v19 }
 0x13a   :  { %v937_v5 = vadd.f32 %v936_v1, %v935_v62  ;;  %v708_v6 = vpop.f32.mrb[47].mxu0  ;;  %v717_v11 = vadd.f32 %v3952_v4, %v4553_v33  ;;  %v830_v15 = vmax.f32 %v714_v2, 0.0  ;;  %v839_v62 = vmax.f32 %v749_v50, 0.0 }
 0x13b   :  { %v828_v9 = vmax.f32 %v706_v3, 0.0  ;;  %v709_v13 = vadd.f32 %v4553_v33, %v708_v6  ;;  %v958_v0 = vsel %vm398_vm0, %v837_v56, 0.0  ;;  %v840_v1 = vmax.f32 %v754_v57, 0.0  ;;  %v4330_v56 = vld [vmem:[%s4603_s25] sm:$0xff]  }
 0x13c   :  { %v939_v14 = vadd.f32 %v938_v8, %v937_v5  ;;  %v831_v22 = vmax.f32 %v717_v11, 0.0  ;;  %v944_v27 = vsel %vm398_vm0, %v830_v15, 0.0  ;;  %v960_v54 = vsel %vm398_vm0, %v838_v58, 0.0  ;;  %v4331_v58 = vld [vmem:[%s4603_s25 + $0x8] sm:$0xff]  }
 0x13d   :  { %v940_v17 = vsel %vm398_vm0, %v828_v9, 0.0  ;;  %v829_v18 = vmax.f32 %v709_v13, 0.0  ;;  %v762_v3 = vadd.f32 %v4629_v10, %v4553_v33  ;;  %v962_v4 = vsel %vm398_vm0, %v839_v62, 0.0  ;;  %v4339_v62 = vld [vmem:[%s4671_s29 + $0x8] sm:$0xff]  }
 0x13e   :  { %v941_v20 = vadd.f32 %v940_v17, %v939_v14  ;;  %v946_v35 = vsel %vm398_vm0, %v831_v22, 0.0  ;;  %v964_v12 = vsel %vm398_vm0, %v840_v1, 0.0  ;;  %v765_v6 = vadd.f32 %v4634_v16, %v4553_v33  ;;  %v4334_v1 = vld [vmem:[%s4603_s25 + $0x20] sm:$0xff]  }
 0x13f   :  { %v942_v23 = vsel %vm398_vm0, %v829_v18, 0.0  ;;  %v841_v7 = vmax.f32 %v757_v48, 0.0  ;;  %v770_v8 = vadd.f32 %v4553_v33, %v4647_v42  ;;  %v842_v19 = vmax.f32 %v762_v3, 0.0  ;;  %v4336_v48 = vld [vmem:[%s4603_s25 + $0x30] sm:$0xff]   ;;  %v4341_v3 = vld [vmem:[%s4671_s29 + $0x18] sm:$0xff]  }
 0x140   :  { %v943_v26 = vadd.f32 %v942_v23, %v941_v20  ;;  %v911_v11 = vrot.slane %v4681_v59, 4  ;;  %v843_v14 = vmax.f32 %v765_v6, 0.0  ;;  %v773_v17 = vadd.f32 %v4553_v33, %v4652_v51 }
 0x141   :  { %v966_v10 = vsel %vm398_vm0, %v841_v7, 0.0  ;;  %v844_v15 = vmax.f32 %v770_v8, 0.0  ;;  %v968_v20 = vsel %vm398_vm0, %v842_v19, 0.0  ;;  %v778_v16 = vadd.f32 %v4645_v40, %v4553_v33  ;;  %v4814_v8 = vld [vmem:[%s3493_s19] ss:$0 sm:$0xff]  ;;  %s3508_s19 = sld [smem:[%s5339_s0 + %s4452_s16]]  }
 0x142   :  { %v945_v31 = vadd.f32 %v944_v27, %v943_v26  ;;  %v912_v42 = vadd.f32 %v911_v11, %v4681_v59  ;;  %v970_v23 = vsel %vm398_vm0, %v843_v14, 0.0  ;;  %v781_v24 = vadd.f32 %v4650_v46, %v4553_v33  ;;  %s4965_s16 = sld [smem:[%s5339_s0 + %s4458_s13]]  }
 0x143   :  { %v972_v25 = vsel %vm398_vm0, %v844_v15, 0.0  ;;  %v845_v26 = vmax.f32 %v773_v17, 0.0  ;;  %v846_v30 = vmax.f32 %v778_v16, 0.0 }
 0x144   :  { %v947_v39 = vadd.f32 %v946_v35, %v945_v31  ;;  %v913_v51 = vrot.slane %v912_v42, 2  ;;  %v847_v34 = vmax.f32 %v781_v24, 0.0  ;;  %v4342_v24 = vld [vmem:[%s4788_s3] sm:$0xff]  }
 0x145   :  { %v974_v35 = vsel %vm398_vm0, %v845_v26, 0.0  ;;  %v976_v40 = vsel %vm398_vm0, %v846_v30, 0.0 }
 0x146   :  { %v949_v41 = vadd.f32 %v948_v36, %v947_v39  ;;  %v914_v59 = vadd.f32 %v913_v51, %v912_v42  ;;  %v978_v38 = vsel %vm398_vm0, %v847_v34, 0.0 }
 0x148   :  { %v951_v47 = vadd.f32 %v950_v44, %v949_v41  ;;  %v915_v32 = vrot.slane %v914_v59, 1 }
 0x14a   :  { %v953_v52 = vadd.f32 %v952_v28, %v951_v47  ;;  %v916_v46 = vadd.f32 %v915_v32, %v914_v59 }
 0x14c   :  { %v955_v60 = vadd.f32 %v954_v53, %v953_v52  ;;  %v987_v45 = vmul.f32 0.00390625, %v916_v46 }
 0x14e   :  { %v957_v61 = vadd.f32 %v956_v55, %v955_v60  ;;  %v989_v28 = vpack.c.bf16 %v987_v45, %v987_v45  ;;  %v4338_v60 = vld [vmem:[%s4671_s29] sm:$0xff]  }
 0x150   :  { %v959_v2 = vadd.f32 %v958_v0, %v957_v61  ;;  %v1002_v50 = vunpack.c.l.b16 %v989_v28  ;;  %v4332_v61 = vld [vmem:[%s4603_s25 + $0x10] sm:$0xff]   ;;  %v4333_v0 = vld [vmem:[%s4603_s25 + $0x18] sm:$0xff]  }
 0x152   :  { %v961_v5 = vadd.f32 %v960_v54, %v959_v2  ;;  %v4337_v2 = vld [vmem:[%s4603_s25 + $0x38] sm:$0xff]   ;;  %v4340_v54 = vld [vmem:[%s4671_s29 + $0x10] sm:$0xff]  }
 0x154   :  { %v963_v9 = vadd.f32 %v962_v4, %v961_v5  ;;  %v4356_v4 = vld [vmem:[%s4805_s15] sm:$0xff]  }
 0x155   :  { %4058 = vmatpush3.bf16.msra.mxu0 %v4356_v4 }
 0x156   :  { %v965_v13 = vadd.f32 %v964_v12, %v963_v9  ;;  %4059 = vmatprep.subr.bf16.mxu0 %v4436_v29 }
 0x158   :  { %v967_v18 = vadd.f32 %v966_v10, %v965_v13 }
 0x15a   :  { %v969_v22 = vadd.f32 %v968_v20, %v967_v18 }
 0x15c   :  { %v971_v27 = vadd.f32 %v970_v23, %v969_v22 }
 0x15e   :  { %v973_v31 = vadd.f32 %v972_v25, %v971_v27 }
 0x160   :  { %v975_v36 = vadd.f32 %v974_v35, %v973_v31 }
 0x162   :  { %v977_v37 = vadd.f32 %v976_v40, %v975_v36  ;;  %v4343_v36 = vld [vmem:[%s4788_s3 + $0x8] sm:$0xff]   ;;  %s4463_s3 = smov 23  }
 0x164   :  { %v979_v39 = vadd.f32 %v978_v38, %v977_v37 }
 0x166   :  { %v980_v41 = vrot.slane %v979_v39, 4 }
 0x168   :  { %v981_v33 = vadd.f32 %v980_v41, %v979_v39 }
 0x16a   :  { %v982_v43 = vrot.slane %v981_v33, 2 }
 0x16c   :  { %v983_v44 = vadd.f32 %v982_v43, %v981_v33 }
 0x16e   :  { %v984_v21 = vrot.slane %v983_v44, 1 }
 0x170   :  { %v985_v47 = vadd.f32 %v984_v21, %v983_v44 }
 0x172   :  { %v988_v49 = vmul.f32 0.00390625, %v985_v47 }
 0x174   :  { %v990_v52 = vpack.c.bf16 %v988_v49, %v988_v49 }
 0x176   :  { %v1003_v53 = vunpack.c.l.b16 %v990_v52 }
 0x178   :  { %v1005_v55 = vsel %vm1004_vm3, %v1003_v53, %v1002_v50 }
 0x179   :  { %v1006_v57 = vpack.c.b16 %v1005_v55, %v1005_v55 }
 0x17b   :  { %3972 = vmatmul.mubr.msk.bf16.vlgmr.msra.gmra.mrb[16].mxu1 %vm398_vm0, %v1006_v57 }
 0x17c   :  { %3976 = vmatpush3.bf16.msra.mxu1 %v4623_v63  ;;  %3977 = vmatprep.mubr.msk.bf16.mxu1 %vm1121_vm4, %v4330_v56  ;;  %v4335_v63 = vld [vmem:[%s4603_s25 + $0x28] sm:$0xff]   ;;  %s4461_s25 = smov 4  }
 0x17d   :  { %3993 = vmatprep.subr.bf16.mxu1 %v4338_v60  ;;  %s3486_s29 = sld [smem:[%s5339_s0 + %s4461_s25]]  }
 0x17e   :  { %s3510_s25 = sld [smem:[%s5339_s0 + %s4468_s22]]  }
 0x183   :  { %3978 = vmatmul.mubr.msk.bf16.vlgmr.msra.gmra.mrb[20].mxu1 %vm1121_vm4, %v4331_v58 }
 0x184   :  { %3981 = vmatprep.mubr.msk.bf16.mxu1 %vm1121_vm4, %v4332_v61  ;;  %3994 = vmatpush3.bf16.msra.mxu1 %v4338_v60 }
 0x185   :  { %3995 = vmatprep.subr.bf16.mxu1 %v4339_v62 }
 0x188   :  { %3996 = vmatpush3.bf16.msra.mxu1 %v4339_v62 }
 0x189   :  { %3997 = vmatprep.subr.bf16.mxu1 %v4340_v54 }
 0x18b   :  { %3982 = vmatmul.mubr.msk.bf16.gmra.mrb[24].mxu1 %vm1121_vm4, %v4333_v0 }
 0x18c   :  { %3985 = vmatprep.mubr.msk.bf16.mxu1 %vm1121_vm4, %v4334_v1  ;;  %3998 = vmatpush3.bf16.msra.mxu1 %v4340_v54 }
 0x18d   :  { %3999 = vmatprep.subr.bf16.mxu1 %v4341_v3 }
 0x190   :  { %4000 = vmatpush3.bf16.msra.mxu1 %v4341_v3 }
 0x191   :  { %4017 = vmatprep.subr.bf16.mxu1 %v4436_v29 }
 0x193   :  { %3986 = vmatmul.mubr.msk.bf16.gmra.mrb[28].mxu1 %vm1121_vm4, %v4335_v63 }
 0x194   :  { %3989 = vmatprep.mubr.msk.bf16.mxu1 %vm1121_vm4, %v4336_v48 }
 0x19b   :  { %3990 = vmatmul.mubr.msk.bf16.gmra.mrb[32].mxu1 %vm1121_vm4, %v4337_v2  ;;  %vm3343_vm4 = vcmask 786112  }
 0x24e   :  { %v4812_v5 = vpop.f32.mrb[16].mxu1 }
 0x24f   :  { %v3973_v12 = vpop.f32.mrb[17].mxu1 }
 0x250   :  { %v1053_v6 = vpop.f32.mrb[18].mxu1  ;;  %v1491_v12 = vld [vmem:[%s3484_s23] sm:$0x1]  ;;  %s3502_s23 = sld [smem:[%s5339_s0 + %s4453_s20]]  }
 0x251   :  { %v3974_v7 = vpop.f32.mrb[19].mxu1  ;;  %v4344_v6 = vld [vmem:[%s4793_s7] sm:$0xff]   ;;  %s4970_s20 = sld [smem:[%s5339_s0 + %s4459_s17]]  }
 0x252   :  { %v4345_v7 = vld [vmem:[%s4793_s7 + $0x8] sm:$0xff]   ;;  %s3506_s17 = sld [smem:[%s5339_s0 + %s4466_s14]]  }
 0x256   :  { %v3979_v9 = vpop.f32.mrb[20].mxu1 }
 0x257   :  { %v1193_v19 = vadd.f32 %v3979_v9, %v4814_v8  ;;  %v1184_v11 = vpop.f32.mrb[21].mxu1  ;;  %v4347_v9 = vld [vmem:[%s4793_s7 + $0x18] sm:$0xff]  }
 0x258   :  { %v1185_v13 = vadd.f32 %v4814_v8, %v1184_v11  ;;  %v3980_v14 = vpop.f32.mrb[22].mxu1  ;;  %v4349_v11 = vld [vmem:[%s4793_s7 + $0x28] sm:$0xff]  }
 0x259   :  { %v1196_v10 = vadd.f32 %v3980_v14, %v4814_v8  ;;  %v1187_v15 = vpop.f32.mrb[23].mxu1  ;;  %v1249_v18 = vmax.f32 %v1193_v19, 0.0  ;;  %v4348_v19 = vld [vmem:[%s4793_s7 + $0x20] sm:$0xff]   ;;  %v4350_v14 = vld [vmem:[%s4793_s7 + $0x30] sm:$0xff]  }
 0x25a   :  { %v1188_v17 = vadd.f32 %v4814_v8, %v1187_v15  ;;  %v1247_v16 = vmax.f32 %v1185_v13, 0.0  ;;  %v3586_v13 = vld [vmem:[%s3491_s27] ss:$0 sm:$0xff]  ;;  %v4351_v15 = vld [vmem:[%s4793_s7 + $0x38] sm:$0xff]   ;;  %s4945_s27 = sld [smem:[%s5339_s0 + %s4454_s24]]  }
 0x25b   :  { %v1250_v20 = vmax.f32 %v1196_v10, 0.0  ;;  %v1051_v10 = vadd.f32 %v3586_v13, %v4812_v5  ;;  %v4354_v5 = vld [vmem:[%s4799_s11 + $0x10] sm:$0xff]   ;;  %s3501_s24 = sld [smem:[%s5339_s0 + %s4460_s21]]  }
 0x25c   :  { %v1248_v42 = vmax.f32 %v1188_v17, 0.0  ;;  %s3507_s21 = sld [smem:[%s5339_s0 + %s4467_s18]]  }
 0x25d   :  { %v1264_v22 = vpack.c.bf16 %v1250_v20, %v1249_v18  ;;  %v1056_v17 = vmax.f32 %v1051_v10, 0.0  ;;  %v4352_v18 = vld [vmem:[%s4799_s11] sm:$0xff]  }
 0x25e   :  { %v1263_v23 = vpack.c.bf16 %v1248_v42, %v1247_v16  ;;  %v3983_v25 = vpop.f32.mrb[24].mxu1  ;;  %v4353_v16 = vld [vmem:[%s4799_s11 + $0x8] sm:$0xff]   ;;  %v4355_v42 = vld [vmem:[%s4799_s11 + $0x18] sm:$0xff]   ;;  %s4451_s11 = smov 17  }
 0x25f   :  { %v1209_v26 = vadd.f32 %v3983_v25, %v4814_v8  ;;  %v1200_v27 = vpop.f32.mrb[25].mxu1  ;;  %v4871_v20 = vpack.c.bf16 %v1056_v17, %v1056_v17  ;;  %v4359_v25 = vld [vmem:[%s3503_s5] sm:$0xff]  }
 0x260   :  { %v1201_v30 = vadd.f32 %v4814_v8, %v1200_v27  ;;  %v3984_v51 = vpop.f32.mrb[26].mxu1  ;;  %4001 = vmatprep.mubr.msk.bf16.mxu1 %vm1310_vm5, %v1263_v23  ;;  %v4357_v23 = vld [vmem:[%s4805_s15 + $0x8] sm:$0xff]   ;;  %v4362_v27 = vld [vmem:[%s3503_s5 + $0x10] sm:$0xff]  }
 0x261   :  { %v1212_v31 = vadd.f32 %v3984_v51, %v4814_v8  ;;  %v1203_v34 = vpop.f32.mrb[27].mxu1  ;;  %4002 = vmatmul.mubr.msk.bf16.vlgmr.msra.gmra.mrb[36].mxu1 %vm1310_vm5, %v1264_v22  ;;  %v1253_v40 = vmax.f32 %v1209_v26, 0.0  ;;  %v1640_v22 = vld [vmem:[%s3485_s1] sm:$0x1]  ;;  %4060 = vmatpush3.bf16.msra.mxu0 %v4357_v23  ;;  %v4358_v26 = vld [vmem:[%s4805_s15 + $0x10] sm:$0xff]   ;;  %s3504_s1 = sld [smem:[%s5339_s0 + %s4455_s28]]  }
 0x262   :  { %v1204_v35 = vadd.f32 %v4814_v8, %v1203_v34  ;;  %4018 = vmatpush3.bf16.msra.mxu1 %v4342_v24  ;;  %v1251_v37 = vmax.f32 %v1201_v30, 0.0  ;;  %4061 = vmatprep.subr.bf16.mxu0 %v4436_v29  ;;  %v4361_v24 = vld [vmem:[%s3503_s5 + $0x8] sm:$0xff]   ;;  %v4363_v30 = vld [vmem:[%s3503_s5 + $0x18] sm:$0xff]   ;;  %v4365_v51 = vld [vmem:[%s3503_s5 + $0x20] sm:$0xff]  }
 0x263   :  { %v1254_v59 = vmax.f32 %v1212_v31, 0.0  ;;  %4019 = vmatprep.subr.bf16.mxu1 %v4436_v29  ;;  %v4366_v31 = vld [vmem:[%s3503_s5 + $0x28] sm:$0xff]   ;;  %v4360_v34 = vld [vmem:[%s4805_s15 + $0x18] sm:$0xff]  }
 0x264   :  { %v1252_v38 = vmax.f32 %v1204_v35, 0.0  ;;  %v4367_v35 = vld [vmem:[%s3503_s5 + $0x30] sm:$0xff]  }
 0x265   :  { %v1266_v39 = vpack.c.bf16 %v1254_v59, %v1253_v40  ;;  %4062 = vmatpush3.bf16.msra.mxu0 %v4358_v26  ;;  %v4369_v40 = vld [vmem:[%s3503_s5 + $0x38] sm:$0xff]   ;;  %v4368_v59 = vld [vmem:[%s4805_s15 + $0x28] sm:$0xff]   ;;  %s4955_s5 = sld [smem:[%s5339_s0 + %s4456_s2]]  }
 0x266   :  { %v1265_v32 = vpack.c.bf16 %v1252_v38, %v1251_v37  ;;  %v3987_v41 = vpop.f32.mrb[28].mxu1  ;;  %4020 = vmatpush3.bf16.msra.mxu1 %v4343_v36  ;;  %4063 = vmatprep.subr.bf16.mxu0 %v4436_v29  ;;  %v4364_v36 = vld [vmem:[%s4805_s15 + $0x20] sm:$0xff]   ;;  %v4370_v37 = vld [vmem:[%s4805_s15 + $0x30] sm:$0xff]   ;;  %v4371_v38 = vld [vmem:[%s4805_s15 + $0x38] sm:$0xff]   ;;  %s3499_s15 = sld [smem:[%s5339_s0 + %s4451_s11]]  }
 0x267   :  { %v1225_v33 = vadd.f32 %v3987_v41, %v4814_v8  ;;  %v1216_v46 = vpop.f32.mrb[29].mxu1  ;;  %4025 = vmatprep.subr.bf16.mxu1 %v4436_v29 }
 0x268   :  { %v1217_v43 = vadd.f32 %v4814_v8, %v1216_v46  ;;  %v3988_v44 = vpop.f32.mrb[30].mxu1  ;;  %4005 = vmatprep.mubr.msk.bf16.mxu1 %vm1310_vm5, %v1265_v32 }
 0x269   :  { %v1228_v45 = vadd.f32 %v3988_v44, %v4814_v8  ;;  %v1219_v21 = vpop.f32.mrb[31].mxu1  ;;  %4006 = vmatmul.mubr.msk.bf16.gmra.mrb[40].mxu1 %vm1310_vm5, %v1266_v39  ;;  %v1257_v28 = vmax.f32 %v1225_v33, 0.0  ;;  %4064 = vmatpush3.bf16.msra.mxu0 %v4360_v34  ;;  %v3606_v39 = vld [vmem:[%s3495_s10] ss:$0 sm:$0xff]  ;;  %s4960_s10 = sld [smem:[%s5339_s0 + %s4457_s6]]  }
 0x26a   :  { %v1220_v47 = vadd.f32 %v4814_v8, %v1219_v21  ;;  %v1255_v52 = vmax.f32 %v1217_v43, 0.0  ;;  %4065 = vmatprep.subr.bf16.mxu0 %v4436_v29  ;;  %s3505_s6 = sld [smem:[%s5339_s0 + %s4463_s3]]  }
 0x26b   :  { %v1258_v49 = vmax.f32 %v1228_v45, 0.0  ;;  %s3512_s3 = sld [smem:[%s5339_s0 + %s4470_s30]]  }
 0x26c   :  { %v1256_v50 = vmax.f32 %v1220_v47, 0.0 }
 0x26d   :  { %v1268_v53 = vpack.c.bf16 %v1258_v49, %v1257_v28  ;;  %4066 = vmatpush3.bf16.msra.mxu0 %v4364_v36 }
 0x26e   :  { %v1267_v55 = vpack.c.bf16 %v1256_v50, %v1255_v52  ;;  %v3991_v56 = vpop.f32.mrb[32].mxu1  ;;  %4067 = vmatprep.subr.bf16.mxu0 %v4436_v29 }
 0x26f   :  { %v1241_v57 = vadd.f32 %v3991_v56, %v4814_v8  ;;  %v1232_v60 = vpop.f32.mrb[33].mxu1 }
 0x270   :  { %v1233_v58 = vadd.f32 %v4814_v8, %v1232_v60  ;;  %v3992_v61 = vpop.f32.mrb[34].mxu1  ;;  %4009 = vmatprep.mubr.msk.bf16.mxu1 %vm1310_vm5, %v1267_v55 }
 0x271   :  { %v1244_v62 = vadd.f32 %v3992_v61, %v4814_v8  ;;  %v1235_v0 = vpop.f32.mrb[35].mxu1  ;;  %4010 = vmatmul.mubr.msk.bf16.gmra.mrb[44].mxu1 %vm1310_vm5, %v1268_v53  ;;  %v1261_v63 = vmax.f32 %v1241_v57, 0.0  ;;  %4068 = vmatpush3.bf16.msra.mxu0 %v4368_v59 }
 0x272   :  { %v1236_v1 = vadd.f32 %v4814_v8, %v1235_v0  ;;  %v1259_v2 = vmax.f32 %v1233_v58, 0.0  ;;  %v4346_v8 = vld [vmem:[%s4793_s7 + $0x10] sm:$0xff]   ;;  %4069 = vmatprep.subr.bf16.mxu0 %v4436_v29  ;;  %s4465_s7 = smov 34  }
 0x273   :  { %v1262_v48 = vmax.f32 %v1244_v62, 0.0  ;;  %s3516_s13 = sld [smem:[%s5339_s0 + %s4465_s7]]   ;;  %s4472_s7 = smov 37  }
 0x274   :  { %v1260_v54 = vmax.f32 %v1236_v1, 0.0 }
 0x275   :  { %v1270_v3 = vpack.c.bf16 %v1262_v48, %v1261_v63  ;;  %4070 = vmatpush3.bf16.msra.mxu0 %v4370_v37 }
 0x276   :  { %v1269_v4 = vpack.c.bf16 %v1260_v54, %v1259_v2  ;;  %4071 = vmatprep.subr.bf16.mxu0 %v4436_v29 }
 0x278   :  { %4013 = vmatprep.mubr.msk.bf16.mxu1 %vm1310_vm5, %v1269_v4 }
 0x279   :  { %4014 = vmatmul.mubr.msk.bf16.gmra.mrb[48].mxu1 %vm1310_vm5, %v1270_v3  ;;  %4072 = vmatpush3.bf16.msra.mxu0 %v4371_v38 }
 0x27a   :  { %4021 = vmatprep.mubr.msk.bf16.mxu1 %vm4437_vm1, %v4436_v29  ;;  %4097 = vmatprep.subr.bf16.mxu0 %v4436_v29 }
 0x281   :  { %4022 = vmatmul.mubr.msk.bf16.vlgmr.msra.gmra.mrb[52].mxu1 %vm1508_vm6, %v1491_v12  ;;  %vm3357_vm6 = vcmask 917312  }
 0x282   :  { %4026 = vmatpush3.bf16.msra.mxu1 %v4344_v6  ;;  %4041 = vmatprep.mubr.msk.bf16.mxu1 %vm4437_vm1, %v4436_v29 }
 0x283   :  { %4027 = vmatprep.subr.bf16.mxu1 %v4436_v29 }
 0x286   :  { %4028 = vmatpush3.bf16.msra.mxu1 %v4345_v7 }
 0x287   :  { %4029 = vmatprep.subr.bf16.mxu1 %v4436_v29 }
 0x28a   :  { %4030 = vmatpush3.bf16.msra.mxu1 %v4346_v8 }
 0x28b   :  { %4031 = vmatprep.subr.bf16.mxu1 %v4436_v29 }
 0x28e   :  { %4032 = vmatpush3.bf16.msra.mxu1 %v4347_v9 }
 0x28f   :  { %4033 = vmatprep.subr.bf16.mxu1 %v4436_v29 }
 0x292   :  { %4034 = vmatpush3.bf16.msra.mxu1 %v4348_v19 }
 0x293   :  { %4035 = vmatprep.subr.bf16.mxu1 %v4436_v29 }
 0x296   :  { %4036 = vmatpush3.bf16.msra.mxu1 %v4349_v11 }
 0x297   :  { %4037 = vmatprep.subr.bf16.mxu1 %v4436_v29 }
 0x29a   :  { %4038 = vmatpush3.bf16.msra.mxu1 %v4350_v14 }
 0x29b   :  { %4039 = vmatprep.subr.bf16.mxu1 %v4436_v29 }
 0x29e   :  { %4040 = vmatpush3.bf16.msra.mxu1 %v4351_v15 }
 0x29f   :  { %4045 = vmatprep.subr.bf16.mxu1 %v4436_v29 }
 0x2a1   :  { %4042 = vmatmul.mubr.bf16.vlgmr.msra.gmra.mrb[56].mxu1 %v4871_v20 }
 0x2a2   :  { %4046 = vmatpush3.bf16.msra.mxu1 %v4352_v18  ;;  %4053 = vmatprep.mubr.msk.bf16.mxu1 %vm4437_vm1, %v4436_v29 }
 0x2a3   :  { %4047 = vmatprep.subr.bf16.mxu1 %v4436_v29 }
 0x2a6   :  { %4048 = vmatpush3.bf16.msra.mxu1 %v4353_v16 }
 0x2a7   :  { %4049 = vmatprep.subr.bf16.mxu1 %v4436_v29 }
 0x2aa   :  { %4050 = vmatpush3.bf16.msra.mxu1 %v4354_v5 }
 0x2ab   :  { %4051 = vmatprep.subr.bf16.mxu1 %v4436_v29 }
 0x2ae   :  { %4052 = vmatpush3.bf16.msra.mxu1 %v4355_v42 }
 0x2af   :  { %4077 = vmatprep.subr.bf16.mxu1 %v4436_v29 }
 0x2b1   :  { %4054 = vmatmul.mubr.msk.bf16.vlgmr.msra.gmra.mrb[60].mxu1 %vm1310_vm5, %v1640_v22 }
 0x2b2   :  { %4093 = vmatprep.mubr.msk.bf16.mxu1 %vm4437_vm1, %v4436_v29  ;;  %4078 = vmatpush3.bf16.msra.mxu1 %v4359_v25 }
 0x2b3   :  { %4079 = vmatprep.subr.bf16.mxu1 %v4436_v29 }
 0x2b6   :  { %4080 = vmatpush3.bf16.msra.mxu1 %v4361_v24 }
 0x2b7   :  { %4081 = vmatprep.subr.bf16.mxu1 %v4436_v29 }
 0x2ba   :  { %4082 = vmatpush3.bf16.msra.mxu1 %v4362_v27 }
 0x2bb   :  { %4083 = vmatprep.subr.bf16.mxu1 %v4436_v29 }
 0x2be   :  { %4084 = vmatpush3.bf16.msra.mxu1 %v4363_v30 }
 0x2bf   :  { %4085 = vmatprep.subr.bf16.mxu1 %v4436_v29 }
 0x2c2   :  { %4086 = vmatpush3.bf16.msra.mxu1 %v4365_v51 }
 0x2c3   :  { %4087 = vmatprep.subr.bf16.mxu1 %v4436_v29 }
 0x2c6   :  { %4088 = vmatpush3.bf16.msra.mxu1 %v4366_v31 }
 0x2c7   :  { %4089 = vmatprep.subr.bf16.mxu1 %v4436_v29 }
 0x2ca   :  { %4090 = vmatpush3.bf16.msra.mxu1 %v4367_v35 }
 0x2cb   :  { %4091 = vmatprep.subr.bf16.mxu1 %v4436_v29 }
 0x2ce   :  { %4092 = vmatpush3.bf16.msra.mxu1 %v4369_v40 }
 0x2cf   :  { %4135 = vmatprep.subr.bf16.mxu1 %v4436_v29 }
 0x334   :  { %v4003_v32 = vpop.f32.mrb[36].mxu1 }
 0x335   :  { %v1378_v41 = vadd.f32 %v4003_v32, %v3606_v39  ;;  %v1369_v33 = vpop.f32.mrb[37].mxu1 }
 0x336   :  { %v1370_v46 = vadd.f32 %v3606_v39, %v1369_v33  ;;  %v4004_v43 = vpop.f32.mrb[38].mxu1 }
 0x337   :  { %v1434_v44 = vmax.f32 %v1378_v41, 0.0  ;;  %v1381_v45 = vadd.f32 %v4004_v43, %v3606_v39  ;;  %v1372_v21 = vpop.f32.mrb[39].mxu1 }
 0x338   :  { %v1432_v47 = vmax.f32 %v1370_v46, 0.0  ;;  %v1373_v28 = vadd.f32 %v3606_v39, %v1372_v21 }
 0x339   :  { %v1435_v49 = vmax.f32 %v1381_v45, 0.0 }
 0x33a   :  { %v1448_v52 = vmax.f32 %v1432_v47, %v1434_v44  ;;  %v1433_v50 = vmax.f32 %v1373_v28, 0.0 }
 0x33c   :  { %v1449_v53 = vmax.f32 %v1433_v50, %v1435_v49  ;;  %v4007_v55 = vpop.f32.mrb[40].mxu1 }
 0x33d   :  { %v1385_v56 = vpop.f32.mrb[41].mxu1  ;;  %v1394_v57 = vadd.f32 %v4007_v55, %v3606_v39 }
 0x33e   :  { %v1386_v60 = vadd.f32 %v3606_v39, %v1385_v56  ;;  %v4008_v58 = vpop.f32.mrb[42].mxu1 }
 0x33f   :  { %v1388_v61 = vpop.f32.mrb[43].mxu1  ;;  %v1397_v0 = vadd.f32 %v4008_v58, %v3606_v39  ;;  %v1438_v63 = vmax.f32 %v1394_v57, 0.0 }
 0x340   :  { %v1436_v62 = vmax.f32 %v1386_v60, 0.0  ;;  %v1389_v1 = vadd.f32 %v3606_v39, %v1388_v61 }
 0x341   :  { %v1439_v3 = vmax.f32 %v1397_v0, 0.0 }
 0x342   :  { %v1450_v48 = vmax.f32 %v1448_v52, %v1436_v62  ;;  %v1437_v2 = vmax.f32 %v1389_v1, 0.0 }
 0x344   :  { %v1452_v54 = vmax.f32 %v1450_v48, %v1438_v63  ;;  %v1451_v4 = vmax.f32 %v1449_v53, %v1437_v2  ;;  %v4011_v12 = vpop.f32.mrb[44].mxu1 }
 0x345   :  { %v1410_v6 = vadd.f32 %v4011_v12, %v3606_v39  ;;  %v1401_v7 = vpop.f32.mrb[45].mxu1 }
 0x346   :  { %v1453_v8 = vmax.f32 %v1451_v4, %v1439_v3  ;;  %v1402_v9 = vadd.f32 %v3606_v39, %v1401_v7  ;;  %v4012_v19 = vpop.f32.mrb[46].mxu1  ;;  %v3635_v4 = vld [vmem:[%s3499_s15] ss:$0 sm:$0xff] }
 0x347   :  { %v1442_v11 = vmax.f32 %v1410_v6, 0.0  ;;  %v1413_v13 = vadd.f32 %v4012_v19, %v3606_v39  ;;  %v1404_v14 = vpop.f32.mrb[47].mxu1 }
 0x348   :  { %v1454_v10 = vmax.f32 %v1452_v54, %v1453_v8  ;;  %v1440_v15 = vmax.f32 %v1402_v9, 0.0  ;;  %v1405_v17 = vadd.f32 %v3606_v39, %v1404_v14  ;;  %v4373_v14 = vld [vmem:[%s3502_s23] sm:$0xff]  }
 0x349   :  { %v1443_v18 = vmax.f32 %v1413_v13, 0.0  ;;  %v4372_v13 = vld [vmem:[%s3508_s19] sm:$0xff]  }
 0x34a   :  { %v1461_v16 = vmax.f32 %v1440_v15, %v1442_v11  ;;  %v1441_v5 = vmax.f32 %v1405_v17, 0.0  ;;  %v1455_v42 = vrot.slane %v1454_v10, 4  ;;  %v4375_v15 = vld [vmem:[%s3502_s23 + $0x8] sm:$0xff]   ;;  %v4376_v17 = vld [vmem:[%s3508_s19 + $0x10] sm:$0xff]  }
 0x34c   :  { %v1462_v22 = vmax.f32 %v1441_v5, %v1443_v18  ;;  %v4015_v23 = vpop.f32.mrb[48].mxu1  ;;  %v1456_v51 = vmax.f32 %v1454_v10, %v1455_v42  ;;  %v4374_v10 = vld [vmem:[%s3508_s19 + $0x8] sm:$0xff]   ;;  %v4377_v18 = vld [vmem:[%s3502_s23 + $0x10] sm:$0xff]   ;;  %v4379_v5 = vld [vmem:[%s3502_s23 + $0x18] sm:$0xff]  }
 0x34d   :  { %v1417_v25 = vpop.f32.mrb[49].mxu1  ;;  %v1426_v24 = vadd.f32 %v4015_v23, %v3606_v39 }
 0x34e   :  { %v1418_v26 = vadd.f32 %v3606_v39, %v1417_v25  ;;  %v4016_v27 = vpop.f32.mrb[50].mxu1  ;;  %v1457_v37 = vrot.slane %v1456_v51, 2 }
 0x34f   :  { %v1420_v30 = vpop.f32.mrb[51].mxu1  ;;  %v1429_v34 = vadd.f32 %v4016_v27, %v3606_v39  ;;  %v1446_v36 = vmax.f32 %v1426_v24, 0.0  ;;  %v3636_v24 = vld [vmem:[%s3501_s24] ss:$0 sm:$0xff] }
 0x350   :  { %v1444_v31 = vmax.f32 %v1418_v26, 0.0  ;;  %v1421_v35 = vadd.f32 %v3606_v39, %v1420_v30  ;;  %v1458_v21 = vmax.f32 %v1456_v51, %v1457_v37  ;;  %v4383_v37 = vld [vmem:[%s4955_s5] sm:$0xff]  }
 0x351   :  { %v1447_v32 = vmax.f32 %v1429_v34, 0.0  ;;  %v4978_v34 = vld [vmem:[%s3504_s1] sm:$0xff]  }
 0x352   :  { %v1463_v40 = vmax.f32 %v1461_v16, %v1444_v31  ;;  %v1445_v59 = vmax.f32 %v1421_v35, 0.0  ;;  %v1459_v49 = vrot.slane %v1458_v21, 1  ;;  %v4378_v16 = vld [vmem:[%s3508_s19 + $0x18] sm:$0xff]   ;;  %v4380_v31 = vld [vmem:[%s4945_s27] sm:$0xff]  }
 0x354   :  { %v1465_v38 = vmax.f32 %v1463_v40, %v1446_v36  ;;  %v1464_v41 = vmax.f32 %v1462_v22, %v1445_v59  ;;  %v1546_v33 = vpop.f32.mrb[52].mxu1  ;;  %v1460_v53 = vmax.f32 %v1458_v21, %v1459_v49  ;;  %v4382_v40 = vld [vmem:[%s4945_s27 + $0x8] sm:$0xff]   ;;  %v2035_v59 = vld [vmem:[%s3486_s29] sm:$0x1]  ;;  %v4392_v21 = vld [vmem:[%s4945_s27 + $0x30] sm:$0xff]  }
 0x355   :  { %v4023_v46 = vpop.f32.mrb[53].mxu1  ;;  %v4395_v49 = vld [vmem:[%s4955_s5 + $0x30] sm:$0xff]  }
 0x356   :  { %v1466_v43 = vmax.f32 %v1464_v41, %v1447_v32  ;;  %v1549_v44 = vpop.f32.mrb[54].mxu1  ;;  %v1847_v57 = vpack.c.bf16 %v1460_v53, %v1460_v53  ;;  %v4385_v32 = vld [vmem:[%s4955_s5 + $0x8] sm:$0xff]   ;;  %v4386_v41 = vld [vmem:[%s4945_s27 + $0x18] sm:$0xff]   ;;  %v4388_v46 = vld [vmem:[%s4945_s27 + $0x20] sm:$0xff]  }
 0x357   :  { %v4024_v45 = vpop.f32.mrb[55].mxu1  ;;  %v4390_v44 = vld [vmem:[%s4945_s27 + $0x28] sm:$0xff]  }
 0x358   :  { %v1467_v47 = vmax.f32 %v1465_v38, %v1466_v43  ;;  %v1867_v58 = vunpack.c.l.b16 %v1847_v57  ;;  %v4384_v38 = vld [vmem:[%s4945_s27 + $0x10] sm:$0xff]   ;;  %v4389_v43 = vld [vmem:[%s4955_s5 + $0x18] sm:$0xff]   ;;  %v4391_v45 = vld [vmem:[%s4955_s5 + $0x20] sm:$0xff]  }
 0x359   :  { %v4398_v53 = vld [vmem:[%s4960_s10 + $0x8] sm:$0xff]   ;;  %v4403_v57 = vld [vmem:[%s4965_s16 + $0x10] sm:$0xff]  }
 0x35a   :  { %v1468_v28 = vrot.slane %v1467_v47, 4 }
 0x35c   :  { %v1469_v52 = vmax.f32 %v1467_v47, %v1468_v28  ;;  %v4393_v47 = vld [vmem:[%s4955_s5 + $0x28] sm:$0xff]   ;;  %v4394_v28 = vld [vmem:[%s4945_s27 + $0x38] sm:$0xff]   ;;  %s4462_s27 = smov 35  }
 0x35d   :  { %s3517_s2 = sld [smem:[%s5339_s0 + %s4462_s27]]  }
 0x35e   :  { %v1470_v50 = vrot.slane %v1469_v52, 2  ;;  %s3511_s27 = sld [smem:[%s5339_s0 + %s4469_s26]]  }
 0x360   :  { %v1471_v39 = vmax.f32 %v1469_v52, %v1470_v50  ;;  %v4396_v52 = vld [vmem:[%s4955_s5 + $0x38] sm:$0xff]   ;;  %v4397_v50 = vld [vmem:[%s4960_s10] sm:$0xff]  }
 0x362   :  { %v1472_v55 = vrot.slane %v1471_v39, 1 }
 0x364   :  { %v1473_v56 = vmax.f32 %v1471_v39, %v1472_v55  ;;  %v4400_v39 = vld [vmem:[%s4960_s10 + $0x18] sm:$0xff]   ;;  %v4401_v55 = vld [vmem:[%s4965_s16] sm:$0xff]  }
 0x366   :  { %v1848_v60 = vpack.c.bf16 %v1473_v56, %v1473_v56  ;;  %v4402_v56 = vld [vmem:[%s4965_s16 + $0x8] sm:$0xff]  }
 0x368   :  { %v1868_v61 = vunpack.c.l.b16 %v1848_v60  ;;  %v4404_v60 = vld [vmem:[%s4965_s16 + $0x18] sm:$0xff]  }
 0x36a   :  { %v1869_v62 = vsel %vm1004_vm3, %v1868_v61, %v1867_v58  ;;  %v4405_v58 = vld [vmem:[%s4965_s16 + $0x20] sm:$0xff]   ;;  %v4406_v61 = vld [vmem:[%s4965_s16 + $0x28] sm:$0xff]  }
 0x36b   :  { %v4919_v0 = vpack.c.b16 %v1869_v62, %v1869_v62  ;;  %v4407_v62 = vld [vmem:[%s4965_s16 + $0x30] sm:$0xff]  }
 0x36d   :  { %4094 = vmatmul.mubr.bf16.vlgmr.msra.gmra.mrb[64].mxu1 %v4919_v0 }
 0x36e   :  { %4143 = vmatprep.mubr.msk.bf16.mxu1 %vm4437_vm1, %v4436_v29  ;;  %4136 = vmatpush3.bf16.msra.mxu1 %v4372_v13  ;;  %v4423_v13 = vld [vmem:[%s4970_s20 + $0x70] sm:$0xff]  }
 0x36f   :  { %4137 = vmatprep.subr.bf16.mxu1 %v4436_v29 }
 0x372   :  { %4138 = vmatpush3.bf16.msra.mxu1 %v4374_v10  ;;  %v4424_v10 = vld [vmem:[%s4970_s20 + $0x78] sm:$0xff]  }
 0x373   :  { %4139 = vmatprep.subr.bf16.mxu1 %v4436_v29 }
 0x374   :  { %v1634_v1 = vpop.f32.mrb[56].mxu1 }
 0x375   :  { %v1635_v63 = vadd.f32 %v1634_v1, %v1546_v33  ;;  %v4043_v48 = vpop.f32.mrb[57].mxu1  ;;  %v4387_v33 = vld [vmem:[%s4955_s5 + $0x10] sm:$0xff]   ;;  %v4408_v1 = vld [vmem:[%s4965_s16 + $0x38] sm:$0xff]  }
 0x376   :  { %v1637_v2 = vpop.f32.mrb[58].mxu1  ;;  %4140 = vmatpush3.bf16.msra.mxu1 %v4376_v17  ;;  %v4410_v48 = vld [vmem:[%s4970_s20 + $0x8] sm:$0xff]   ;;  %v4427_v17 = vld [vmem:[%s3517_s2 + $0x10] sm:$0xff]  }
 0x377   :  { %v4044_v54 = vpop.f32.mrb[59].mxu1  ;;  %4141 = vmatprep.subr.bf16.mxu1 %v4436_v29  ;;  %v4411_v2 = vld [vmem:[%s4970_s20 + $0x10] sm:$0xff]  }
 0x378   :  { %v4412_v54 = vld [vmem:[%s4970_s20 + $0x18] sm:$0xff]  }
 0x37a   :  { %4142 = vmatpush3.bf16.msra.mxu1 %v4378_v16  ;;  %v4429_v16 = vld [vmem:[%s3517_s2 + $0x20] sm:$0xff]  }
 0x37b   :  { %4147 = vmatprep.subr.bf16.mxu1 %v4436_v29 }
 0x384   :  { %v1710_v3 = vpop.f32.mrb[60].mxu1 }
 0x385   :  { %v1716_v12 = vadd.f32 %v1710_v3, %v1635_v63  ;;  %v4055_v6 = vpop.f32.mrb[61].mxu1  ;;  %v4409_v63 = vld [vmem:[%s4970_s20] sm:$0xff]  }
 0x386   :  { %v1713_v7 = vpop.f32.mrb[62].mxu1  ;;  %v4413_v3 = vld [vmem:[%s4970_s20 + $0x20] sm:$0xff]  }
 0x387   :  { %v1724_v8 = vadd.f32 %v3635_v4, %v1716_v12  ;;  %v4056_v9 = vpop.f32.mrb[63].mxu1  ;;  %v4415_v4 = vld [vmem:[%s4970_s20 + $0x30] sm:$0xff]   ;;  %v4416_v12 = vld [vmem:[%s4970_s20 + $0x38] sm:$0xff]   ;;  %v4417_v6 = vld [vmem:[%s4970_s20 + $0x40] sm:$0xff]  }
 0x388   :  { %v4418_v7 = vld [vmem:[%s4970_s20 + $0x48] sm:$0xff]   ;;  %v4420_v9 = vld [vmem:[%s4970_s20 + $0x58] sm:$0xff]  }
 0x389   :  { %v1725_v19 = vmax.f32 %v1724_v8, 0.0  ;;  %v4419_v8 = vld [vmem:[%s4970_s20 + $0x50] sm:$0xff]  }
 0x38b   :  { %v1726_v11 = vpack.c.bf16 %v1725_v19, %v1725_v19  ;;  %v4421_v19 = vld [vmem:[%s4970_s20 + $0x60] sm:$0xff]  }
 0x38d   :  { %4074 = vmatmul.mubr.bf16.vlgmr.msra.gmra.mrb[48].mxu0 %v1726_v11  ;;  %v4422_v11 = vld [vmem:[%s4970_s20 + $0x68] sm:$0xff]  }
 0x38e   :  { %4105 = vmatprep.mubr.msk.bf16.mxu0 %vm4437_vm1, %v4436_v29  ;;  %4098 = vmatpush3.bf16.msra.mxu0 %v4373_v14  ;;  %v4425_v14 = vld [vmem:[%s3517_s2] sm:$0xff]  }
 0x38f   :  { %4099 = vmatprep.subr.bf16.mxu0 %v4436_v29 }
 0x392   :  { %4100 = vmatpush3.bf16.msra.mxu0 %v4375_v15  ;;  %v4426_v15 = vld [vmem:[%s3517_s2 + $0x8] sm:$0xff]  }
 0x393   :  { %4101 = vmatprep.subr.bf16.mxu0 %v4436_v29 }
 0x396   :  { %4102 = vmatpush3.bf16.msra.mxu0 %v4377_v18  ;;  %v4428_v18 = vld [vmem:[%s3517_s2 + $0x18] sm:$0xff]  }
 0x397   :  { %4103 = vmatprep.subr.bf16.mxu0 %v4436_v29 }
 0x39a   :  { %4104 = vmatpush3.bf16.msra.mxu0 %v4379_v5  ;;  %v4430_v5 = vld [vmem:[%s3517_s2 + $0x28] sm:$0xff]  }
 0x39b   :  { %4109 = vmatprep.subr.bf16.mxu0 %v4436_v29 }
 0x440   :  { %v4972_v42 = vpop.f32.mrb[64].mxu1 }
 0x441   :  { %v4095_v22 = vpop.f32.mrb[65].mxu1 }
 0x442   :  { %v1957_v23 = vpop.f32.mrb[66].mxu1  ;;  %v4431_v22 = vld [vmem:[%s3517_s2 + $0x30] sm:$0xff]  }
 0x443   :  { %v4096_v25 = vpop.f32.mrb[67].mxu1  ;;  %v4432_v23 = vld [vmem:[%s3517_s2 + $0x38] sm:$0xff]  }
 0x460   :  { %v1832_v26 = vpop.f32.mrb[48].mxu0 }
 0x461   :  { %v1833_v27 = vadd.f32 %v3636_v24, %v1832_v26  ;;  %v4075_v30 = vpop.f32.mrb[49].mxu0 }
 0x462   :  { %v1835_v51 = vpop.f32.mrb[50].mxu0 }
 0x463   :  { %v4983_v35 = vpack.c.bf16 %v1833_v27, %v1833_v27  ;;  %v4076_v36 = vpop.f32.mrb[51].mxu0 }
 0x464   :  { %v3658_v36 = vld [vmem:[%s3505_s6] ss:$0 sm:$0xff] }
 0x465   :  { %4106 = vmatmul.mubr.msk.bf16.vlgmr.msra.gmra.mrb[52].mxu0 %vm1310_vm5, %v4983_v35  ;;  %4144 = vmatmul.mubr.msk.bf16.vlgmr.msra.gmra.mrb[68].mxu1 %vm1310_vm5, %v4983_v35 }
 0x466   :  { %4148 = vmatpush3.bf16.msra.mxu1 %v4380_v31  ;;  %4110 = vmatpush3.bf16.msra.mxu0 %v4978_v34 }
 0x467   :  { %4149 = vmatprep.subr.bf16.mxu1 %v4436_v29  ;;  %4111 = vmatprep.mubr.msk.bf16.mxu0 %vm4437_vm1, %v4436_v29 }
 0x468   :  { %4115 = vmatprep.subr.bf16.mxu0 %v4436_v29  ;;  %4163 = vmatprep.mubr.msk.bf16.mxu1 %vm4437_vm1, %v4436_v29 }
 0x46a   :  { %4150 = vmatpush3.bf16.msra.mxu1 %v4382_v40 }
 0x46b   :  { %4151 = vmatprep.subr.bf16.mxu1 %v4436_v29 }
 0x46d   :  { %4112 = vmatmul.mubr.msk.bf16.vlgmr.msra.gmra.mrb[56].mxu0 %vm398_vm0, %v2035_v59 }
 0x46e   :  { %4116 = vmatpush3.bf16.msra.mxu0 %v4383_v37  ;;  %4152 = vmatpush3.bf16.msra.mxu1 %v4384_v38 }
 0x46f   :  { %4117 = vmatprep.subr.bf16.mxu0 %v4436_v29  ;;  %4153 = vmatprep.subr.bf16.mxu1 %v4436_v29 }
 0x470   :  { %4131 = vmatprep.mubr.msk.bf16.mxu0 %vm4437_vm1, %v4436_v29 }
 0x472   :  { %4118 = vmatpush3.bf16.msra.mxu0 %v4385_v32  ;;  %4154 = vmatpush3.bf16.msra.mxu1 %v4386_v41 }
 0x473   :  { %4119 = vmatprep.subr.bf16.mxu0 %v4436_v29  ;;  %4155 = vmatprep.subr.bf16.mxu1 %v4436_v29 }
 0x476   :  { %4120 = vmatpush3.bf16.msra.mxu0 %v4387_v33  ;;  %4156 = vmatpush3.bf16.msra.mxu1 %v4388_v46 }
 0x477   :  { %4121 = vmatprep.subr.bf16.mxu0 %v4436_v29  ;;  %4157 = vmatprep.subr.bf16.mxu1 %v4436_v29 }
 0x47a   :  { %4122 = vmatpush3.bf16.msra.mxu0 %v4389_v43  ;;  %4158 = vmatpush3.bf16.msra.mxu1 %v4390_v44 }
 0x47b   :  { %4123 = vmatprep.subr.bf16.mxu0 %v4436_v29  ;;  %4159 = vmatprep.subr.bf16.mxu1 %v4436_v29 }
 0x47e   :  { %4124 = vmatpush3.bf16.msra.mxu0 %v4391_v45  ;;  %4160 = vmatpush3.bf16.msra.mxu1 %v4392_v21 }
 0x47f   :  { %4125 = vmatprep.subr.bf16.mxu0 %v4436_v29  ;;  %4161 = vmatprep.subr.bf16.mxu1 %v4436_v29 }
 0x482   :  { %4126 = vmatpush3.bf16.msra.mxu0 %v4393_v47  ;;  %4162 = vmatpush3.bf16.msra.mxu1 %v4394_v28 }
 0x483   :  { %4127 = vmatprep.subr.bf16.mxu0 %v4436_v29  ;;  %4199 = vmatprep.subr.bf16.mxu1 %v4436_v29 }
 0x485   :  { %4164 = vmatmul.mubr.bf16.vlgmr.msra.gmra.mrb[72].mxu1 %v4871_v20  ;;  %v4399_v20 = vld [vmem:[%s4960_s10 + $0x10] sm:$0xff]  }
 0x486   :  { %4128 = vmatpush3.bf16.msra.mxu0 %v4395_v49  ;;  %4215 = vmatprep.mubr.msk.bf16.mxu1 %vm4437_vm1, %v4436_v29 }
 0x487   :  { %4129 = vmatprep.subr.bf16.mxu0 %v4436_v29  ;;  %4200 = vmatpush3.bf16.msra.mxu1 %v4425_v14 }
 0x488   :  { %4201 = vmatprep.subr.bf16.mxu1 %v4436_v29 }
 0x48a   :  { %4130 = vmatpush3.bf16.msra.mxu0 %v4396_v52 }
 0x48b   :  { %4167 = vmatprep.subr.bf16.mxu0 %v4436_v29  ;;  %4202 = vmatpush3.bf16.msra.mxu1 %v4426_v15 }
 0x48c   :  { %4203 = vmatprep.subr.bf16.mxu1 %v4436_v29 }
 0x48d   :  { %4132 = vmatmul.mubr.bf16.vlgmr.msra.gmra.mrb[60].mxu0 %v4919_v0 }
 0x48e   :  { %4168 = vmatpush3.bf16.msra.mxu0 %v4397_v50  ;;  %4175 = vmatprep.mubr.msk.bf16.mxu0 %vm4437_vm1, %v4436_v29 }
 0x48f   :  { %4169 = vmatprep.subr.bf16.mxu0 %v4436_v29  ;;  %4204 = vmatpush3.bf16.msra.mxu1 %v4427_v17  ;;  %v5135_v17 = vld [vmem:[%s3506_s17] ss:$0 sm:$0xff] }
 0x490   :  { %4205 = vmatprep.subr.bf16.mxu1 %v4436_v29 }
 0x492   :  { %4170 = vmatpush3.bf16.msra.mxu0 %v4398_v53 }
 0x493   :  { %4171 = vmatprep.subr.bf16.mxu0 %v4436_v29  ;;  %4206 = vmatpush3.bf16.msra.mxu1 %v4428_v18 }
 0x494   :  { %4207 = vmatprep.subr.bf16.mxu1 %v4436_v29 }
 0x496   :  { %4172 = vmatpush3.bf16.msra.mxu0 %v4399_v20  ;;  %v4464_v20 = vmov 1966171168  }
 0x497   :  { %4173 = vmatprep.subr.bf16.mxu0 %v4436_v29  ;;  %4208 = vmatpush3.bf16.msra.mxu1 %v4429_v16 }
 0x498   :  { %4209 = vmatprep.subr.bf16.mxu1 %v4436_v29 }
 0x49a   :  { %4174 = vmatpush3.bf16.msra.mxu0 %v4400_v39  ;;  %v3038_v39 = vunpack.c.l.s4 %v4464_v20 }
 0x49b   :  { %4179 = vmatprep.subr.bf16.mxu0 %v4436_v29  ;;  %4210 = vmatpush3.bf16.msra.mxu1 %v4430_v5 }
 0x49c   :  { %4211 = vmatprep.subr.bf16.mxu1 %v4436_v29 }
 0x49d   :  { %4176 = vmatmul.mubr.msk.bf16.vlgmr.msra.gmra.mrb[64].mxu0 %vm1310_vm5, %v4983_v35  ;;  %vm3350_vm5 = vcmask 851712  }
 0x49e   :  { %4180 = vmatpush3.bf16.msra.mxu0 %v4401_v55  ;;  %4195 = vmatprep.mubr.msk.bf16.mxu0 %vm4437_vm1, %v4436_v29  ;;  %v3040_v55 = vlaneseq  ;;  %vm3329_vm1 = vcmask 654912  }
 0x49f   :  { %4181 = vmatprep.subr.bf16.mxu0 %v4436_v29  ;;  %4212 = vmatpush3.bf16.msra.mxu1 %v4431_v22 }
 0x4a0   :  { %4213 = vmatprep.subr.bf16.mxu1 %v4436_v29 }
 0x4a2   :  { %4182 = vmatpush3.bf16.msra.mxu0 %v4402_v56  ;;  %v3039_v56 = vunpack.c.0.s8 %v3038_v39 }
 0x4a3   :  { %4183 = vmatprep.subr.bf16.mxu0 %v4436_v29  ;;  %4214 = vmatpush3.bf16.msra.mxu1 %v4432_v23 }
 0x4a6   :  { %4184 = vmatpush3.bf16.msra.mxu0 %v4403_v57  ;;  %v5116_v57 = vshrl.u32 %v3040_v55, 7 }
 0x4a7   :  { %4185 = vmatprep.subr.bf16.mxu0 %v4436_v29 }
 0x4aa   :  { %4186 = vmatpush3.bf16.msra.mxu0 %v4404_v60  ;;  %v5122_v60 = vsub.s32 %v3039_v56, %v5116_v57 }
 0x4ab   :  { %4187 = vmatprep.subr.bf16.mxu0 %v4436_v29 }
 0x4ae   :  { %4188 = vmatpush3.bf16.msra.mxu0 %v4405_v58 }
 0x4af   :  { %4189 = vmatprep.subr.bf16.mxu0 %v4436_v29 }
 0x4b2   :  { %4190 = vmatpush3.bf16.msra.mxu0 %v4406_v61 }
 0x4b3   :  { %4191 = vmatprep.subr.bf16.mxu0 %v4436_v29 }
 0x4b6   :  { %4192 = vmatpush3.bf16.msra.mxu0 %v4407_v62  ;;  %v3700_v62 = vld [vmem:[%s3516_s13] ss:$0 sm:$0xff]  ;;  %s3519_s13 = sld [smem:[%s5339_s0 + %s4472_s7]]  }
 0x4b7   :  { %4193 = vmatprep.subr.bf16.mxu0 %v4436_v29 }
 0x4ba   :  { %4194 = vmatpush3.bf16.msra.mxu0 %v4408_v1 }
 0x4bb   :  { %4219 = vmatprep.subr.bf16.mxu0 %v4978_v34 }
 0x4bd   :  { %4196 = vmatmul.mubr.bf16.vlgmr.msra.gmra.mrb[68].mxu0 %v4919_v0  ;;  %v4414_v0 = vld [vmem:[%s4970_s20 + $0x28] sm:$0xff]  }
 0x4be   :  { %4220 = vmatpush3.bf16.msra.mxu0 %v4978_v34  ;;  %4221 = vmatprep.mubr.msk.bf16.mxu0 %vm398_vm0, %v4409_v63 }
 0x4c5   :  { %4222 = vmatmul.mubr.msk.bf16.vlgmr.msra.gmra.mrb[72].mxu0 %vm398_vm0, %v4410_v48 }
 0x4c6   :  { %4225 = vmatprep.mubr.msk.bf16.mxu0 %vm398_vm0, %v4411_v2 }
 0x4cd   :  { %4226 = vmatmul.mubr.msk.bf16.gmra.mrb[76].mxu0 %vm398_vm0, %v4412_v54  ;;  %v3061_v54 = vsub.s32 0, %v5116_v57 }
 0x4ce   :  { %4229 = vmatprep.mubr.msk.bf16.mxu0 %vm398_vm0, %v4413_v3 }
 0x4d5   :  { %4230 = vmatmul.mubr.msk.bf16.gmra.mrb[80].mxu0 %vm398_vm0, %v4414_v0 }
 0x4d6   :  { %4233 = vmatprep.mubr.msk.bf16.mxu0 %vm398_vm0, %v4415_v4 }
 0x4dd   :  { %4234 = vmatmul.mubr.msk.bf16.gmra.mrb[84].mxu0 %vm398_vm0, %v4416_v12 }
 0x4de   :  { %4237 = vmatprep.mubr.msk.bf16.mxu0 %vm398_vm0, %v4417_v6 }
 0x4e5   :  { %4238 = vmatmul.mubr.msk.bf16.gmra.mrb[88].mxu0 %vm398_vm0, %v4418_v7 }
 0x4e6   :  { %4241 = vmatprep.mubr.msk.bf16.mxu0 %vm398_vm0, %v4419_v8 }
 0x4ed   :  { %4242 = vmatmul.mubr.msk.bf16.gmra.mrb[92].mxu0 %vm398_vm0, %v4420_v9 }
 0x4ee   :  { %4245 = vmatprep.mubr.msk.bf16.mxu0 %vm398_vm0, %v4421_v19 }
 0x4f5   :  { %4246 = vmatmul.mubr.msk.bf16.gmra.mrb[96].mxu0 %vm398_vm0, %v4422_v11 }
 0x4f6   :  { %4249 = vmatprep.mubr.msk.bf16.mxu0 %vm398_vm0, %v4423_v13 }
 0x4fd   :  { %4250 = vmatmul.mubr.msk.bf16.gmra.mrb[100].mxu0 %vm398_vm0, %v4424_v10 }
 0x538   :  { %v2021_v25 = vpop.f32.mrb[52].mxu0  ;;  %v2279_v24 = vpop.f32.mrb[68].mxu1 }
 0x539   :  { %v2022_v26 = vadd.f32 %v2021_v25, %v4972_v42  ;;  %v4107_v27 = vpop.f32.mrb[53].mxu0  ;;  %v4145_v30 = vpop.f32.mrb[69].mxu1 }
 0x53a   :  { %v2024_v51 = vpop.f32.mrb[54].mxu0  ;;  %v2282_v31 = vpop.f32.mrb[70].mxu1 }
 0x53b   :  { %v4108_v34 = vpop.f32.mrb[55].mxu0  ;;  %v4146_v35 = vpop.f32.mrb[71].mxu1  ;;  %v2034_v40 = vadd.f32 %v3658_v36, %v2022_v26 }
 0x53d   :  { %v5125_v58 = vrot.slane %v2034_v40, %v5122_v60 }
 0x53f   :  { %v3051_v2 = vrot.slane %v5125_v58, %v5122_v60 }
 0x540   :  { %v2081_v29 = vpop.f32.mrb[56].mxu0 }
 0x541   :  { %v5111_v59 = vadd.f32 %v2081_v29, %v2034_v40  ;;  %v4113_v37 = vpop.f32.mrb[57].mxu0  ;;  %v3062_v12 = vrot.slane %v3051_v2, %v3061_v54 }
 0x542   :  { %v2084_v38 = vpop.f32.mrb[58].mxu0 }
 0x543   :  { %v4114_v32 = vpop.f32.mrb[59].mxu0 }
 0x558   :  { %v2419_v41 = vpop.f32.mrb[72].mxu1 }
 0x559   :  { %v4165_v33 = vpop.f32.mrb[73].mxu1 }
 0x55a   :  { %v2422_v46 = vpop.f32.mrb[74].mxu1 }
 0x55b   :  { %v4166_v43 = vpop.f32.mrb[75].mxu1 }
 0x560   :  { %v2215_v44 = vpop.f32.mrb[60].mxu0 }
 0x561   :  { %v5113_v42 = vadd.f32 %v2279_v24, %v2215_v44  ;;  %v4133_v45 = vpop.f32.mrb[61].mxu0 }
 0x562   :  { %v2218_v21 = vpop.f32.mrb[62].mxu0 }
 0x563   :  { %v4134_v47 = vpop.f32.mrb[63].mxu0  ;;  %v3044_v21 = vcombine.high %v5125_v58, %v5125_v58 }
 0x565   :  { %v3058_v39 = vrot.slane %v3044_v21, %v5122_v60 }
 0x570   :  { %v2483_v28 = vpop.f32.mrb[64].mxu0 }
 0x571   :  { %v2484_v49 = vadd.f32 %v2483_v28, %v2419_v41  ;;  %v4177_v52 = vpop.f32.mrb[65].mxu0 }
 0x572   :  { %v2486_v50 = vpop.f32.mrb[66].mxu0 }
 0x573   :  { %v4178_v53 = vpop.f32.mrb[67].mxu0 }
 0x590   :  { %v2587_v61 = vpop.f32.mrb[68].mxu0 }
 0x591   :  { %v2593_v1 = vadd.f32 %v2587_v61, %v2484_v49  ;;  %v4197_v63 = vpop.f32.mrb[69].mxu0 }
 0x592   :  { %v2590_v48 = vpop.f32.mrb[70].mxu0  ;;  %v5157_v63 = vrot.slane %v3058_v39, %v3061_v54 }
 0x593   :  { %v2601_v3 = vadd.f32 %v3700_v62, %v2593_v1  ;;  %v4198_v0 = vpop.f32.mrb[71].mxu0 }
 0x595   :  { %v2602_v4 = vmax.f32 %v2601_v3, 0.0 }
 0x597   :  { %v2603_v6 = vpack.c.bf16 %v2602_v4, %v2602_v4 }
 0x598   :  { %v4223_v7 = vpop.f32.mrb[72].mxu0 }
 0x599   :  { %v3071_v8 = vadd.f32 %v4223_v7, %v3062_v12  ;;  %4216 = vmatmul.mubr.bf16.vlgmr.msra.gmra.mrb[76].mxu1 %v2603_v6  ;;  %v2909_v9 = vpop.f32.mrb[73].mxu0 }
 0x59a   :  { %v3069_v19 = vadd.f32 %v3062_v12, %v2909_v9  ;;  %v4224_v11 = vpop.f32.mrb[74].mxu0 }
 0x59b   :  { %v3103_v13 = vmax.f32 %v3071_v8, 0.0  ;;  %v3072_v14 = vadd.f32 %v4224_v11, %v3062_v12  ;;  %v2912_v10 = vpop.f32.mrb[75].mxu0 }
 0x59c   :  { %v3070_v15 = vadd.f32 %v3062_v12, %v2912_v10  ;;  %v3101_v18 = vmax.f32 %v3069_v19, 0.0 }
 0x59d   :  { %v3135_v16 = vmul.f32 %v5135_v17, %v3103_v13  ;;  %v3104_v22 = vmax.f32 %v3072_v14, 0.0 }
 0x59e   :  { %v3133_v24 = vmul.f32 %v5135_v17, %v3101_v18  ;;  %v3102_v34 = vmax.f32 %v3070_v15, 0.0 }
 0x59f   :  { %3169 = vadd.xlane.f32.xlu0 %v3135_v16  ;;  %v3136_v35 = vmul.f32 %v5135_v17, %v3104_v22 }
 0x5a0   :  { %v4227_v5 = vpop.f32.mrb[76].mxu0  ;;  %v3134_v38 = vmul.f32 %v5135_v17, %v3102_v34 }
 0x5a1   :  { %v3075_v23 = vadd.f32 %v4227_v5, %v3062_v12  ;;  %v2925_v25 = vpop.f32.mrb[77].mxu0 }
 0x5a2   :  { %v3073_v26 = vadd.f32 %v3062_v12, %v2925_v25  ;;  %v4228_v27 = vpop.f32.mrb[78].mxu0 }
 0x5a3   :  { %v3076_v30 = vadd.f32 %v4228_v27, %v3062_v12  ;;  %v2928_v51 = vpop.f32.mrb[79].mxu0  ;;  %3165 = vadd.xlane.f32.xlu0 %v3133_v24  ;;  %v3107_v40 = vmax.f32 %v3075_v23, 0.0 }
 0x5a4   :  { %v3074_v31 = vadd.f32 %v3062_v12, %v2928_v51  ;;  %v3105_v44 = vmax.f32 %v3073_v26, 0.0 }
 0x5a5   :  { %v3139_v45 = vmul.f32 %v5135_v17, %v3107_v40  ;;  %v3108_v28 = vmax.f32 %v3076_v30, 0.0 }
 0x5a6   :  { %v3137_v50 = vmul.f32 %v5135_v17, %v3105_v44  ;;  %v3106_v58 = vmax.f32 %v3074_v31, 0.0 }
 0x5a7   :  { %3171 = vadd.xlane.f32.xlu0 %v3136_v35  ;;  %v3140_v1 = vmul.f32 %v5135_v17, %v3108_v28 }
 0x5a8   :  { %v4231_v36 = vpop.f32.mrb[80].mxu0  ;;  %v3138_v60 = vmul.f32 %v5135_v17, %v3106_v58 }
 0x5a9   :  { %v3079_v29 = vadd.f32 %v4231_v36, %v3062_v12  ;;  %v2941_v37 = vpop.f32.mrb[81].mxu0 }
 0x5aa   :  { %v3077_v32 = vadd.f32 %v3062_v12, %v2941_v37  ;;  %v4232_v41 = vpop.f32.mrb[82].mxu0 }
 0x5ab   :  { %v3080_v33 = vadd.f32 %v4232_v41, %v3062_v12  ;;  %v2944_v46 = vpop.f32.mrb[83].mxu0  ;;  %3167 = vadd.xlane.f32.xlu0 %v3134_v38  ;;  %v3111_v2 = vmax.f32 %v3079_v29, 0.0 }
 0x5ac   :  { %v3078_v43 = vadd.f32 %v3062_v12, %v2944_v46  ;;  %v3109_v54 = vmax.f32 %v3077_v32, 0.0 }
 0x5ad   :  { %v3143_v11 = vmul.f32 %v5135_v17, %v3111_v2  ;;  %v3112_v14 = vmax.f32 %v3080_v33, 0.0 }
 0x5ae   :  { %v3141_v5 = vmul.f32 %v5135_v17, %v3109_v54  ;;  %v3110_v27 = vmax.f32 %v3078_v43, 0.0 }
 0x5af   :  { %3177 = vadd.xlane.f32.xlu0 %v3139_v45  ;;  %v3144_v31 = vmul.f32 %v5135_v17, %v3112_v14 }
 0x5b0   :  { %v4235_v47 = vpop.f32.mrb[84].mxu0  ;;  %v3142_v36 = vmul.f32 %v5135_v17, %v3110_v27 }
 0x5b1   :  { %v5144_v49 = vadd.f32 %v4235_v47, %v3062_v12  ;;  %v2957_v52 = vpop.f32.mrb[85].mxu0 }
 0x5b2   :  { %v5147_v53 = vadd.f32 %v3062_v12, %v2957_v52  ;;  %v4236_v20 = vpop.f32.mrb[86].mxu0 }
 0x5b3   :  { %v5150_v56 = vadd.f32 %v4236_v20, %v3062_v12  ;;  %v2960_v61 = vpop.f32.mrb[87].mxu0  ;;  %3173 = vadd.xlane.f32.xlu0 %v3137_v50  ;;  %v3115_v40 = vmax.f32 %v5144_v49, 0.0 }
 0x5b4   :  { %v5152_v62 = vadd.f32 %v3062_v12, %v2960_v61  ;;  %v3113_v45 = vmax.f32 %v5147_v53, 0.0 }
 0x5b5   :  { %v3147_v47 = vmul.f32 %v5135_v17, %v3115_v40 }
 0x5b6   :  { %v3114_v49 = vmax.f32 %v5152_v62, 0.0  ;;  %v3145_v61 = vmul.f32 %v5135_v17, %v3113_v45  ;;  %v3116_v62 = vmax.f32 %v5150_v56, 0.0 }
 0x5b7   :  { %3179 = vadd.xlane.f32.xlu0 %v3140_v1 }
 0x5b8   :  { %v4239_v48 = vpop.f32.mrb[88].mxu0 }
 0x5b9   :  { %v3087_v3 = vadd.f32 %v4239_v48, %v5157_v63  ;;  %v2973_v0 = vpop.f32.mrb[89].mxu0 }
 0x5ba   :  { %v3085_v4 = vadd.f32 %v5157_v63, %v2973_v0  ;;  %v4240_v6 = vpop.f32.mrb[90].mxu0 }
 0x5bb   :  { %v3119_v12 = vmax.f32 %v3087_v3, 0.0  ;;  %v3088_v7 = vadd.f32 %v4240_v6, %v5157_v63  ;;  %v2976_v8 = vpop.f32.mrb[91].mxu0  ;;  %3175 = vadd.xlane.f32.xlu0 %v3138_v60  ;;  %v3146_v60 = vmul.f32 %v5135_v17, %v3114_v49  ;;  %v2088_v6 = vmax.f32 %v5111_v59, 0.0 }
 0x5bc   :  { %v3086_v9 = vadd.f32 %v5157_v63, %v2976_v8  ;;  %v3117_v19 = vmax.f32 %v3085_v4, 0.0 }
 0x5bd   :  { %v3151_v13 = vmul.f32 %v5135_v17, %v3119_v12  ;;  %v3120_v15 = vmax.f32 %v3088_v7, 0.0  ;;  %v3148_v7 = vmul.f32 %v5135_v17, %v3116_v62 }
 0x5be   :  { %v3149_v22 = vmul.f32 %v5135_v17, %v3117_v19  ;;  %v3118_v51 = vmax.f32 %v3086_v9, 0.0  ;;  %v2096_v9 = vmul.f32 %v5135_v17, %v2088_v6 }
 0x5bf   :  { %3185 = vadd.xlane.f32.xlu0 %v3143_v11  ;;  %3201 = vadd.xlane.f32.xlu1 %v3151_v13  ;;  %v3152_v34 = vmul.f32 %v5135_v17, %v3120_v15  ;;  %v80_v11 = vstv %s3507_s21 }
 0x5c0   :  { %v4243_v10 = vpop.f32.mrb[92].mxu0  ;;  %v3150_v32 = vmul.f32 %v5135_v17, %v3118_v51  ;;  %v2098_v54 = vsel %vm2097_vm7, %v2096_v9, 0.0  ;;  %81 = vst [vmem:[#allocation2] sm:$0x1] %v80_v11 }
 0x5c1   :  { %v3091_v18 = vadd.f32 %v4243_v10, %v5157_v63  ;;  %v2989_v16 = vpop.f32.mrb[93].mxu0 }
 0x5c2   :  { %v3089_v23 = vadd.f32 %v5157_v63, %v2989_v16  ;;  %v4244_v25 = vpop.f32.mrb[94].mxu0 }
 0x5c3   :  { %v3092_v24 = vadd.f32 %v4244_v25, %v5157_v63  ;;  %v2992_v26 = vpop.f32.mrb[95].mxu0  ;;  %3181 = vadd.xlane.f32.xlu0 %v3141_v5  ;;  %3197 = vadd.xlane.f32.xlu1 %v3149_v22  ;;  %v3123_v29 = vmax.f32 %v3091_v18, 0.0  ;;  %v3676_v5 = vld [vmem:[%s3510_s25] ss:$0 sm:$0xff] }
 0x5c4   :  { %v3090_v30 = vadd.f32 %v5157_v63, %v2992_v26  ;;  %v3121_v21 = vmax.f32 %v3089_v23, 0.0  ;;  %v2292_v25 = vadd.f32 %v3676_v5, %v5113_v42  ;;  %v82_v42 = vstv %s3512_s3 }
 0x5c5   :  { %v3155_v28 = vmul.f32 %v5135_v17, %v3123_v29  ;;  %v3124_v50 = vmax.f32 %v3092_v24, 0.0  ;;  %83 = vst [vmem:[#allocation3] sm:$0x1] %v82_v42 }
 0x5c6   :  { %v3153_v58 = vmul.f32 %v5135_v17, %v3121_v21  ;;  %v3122_v0 = vmax.f32 %v3090_v30, 0.0  ;;  %v2293_v27 = vmax.f32 %v2292_v25, 0.0  ;;  %v3677_v30 = vld [vmem:[%s3511_s27] ss:$0 sm:$0xff] }
 0x5c7   :  { %3187 = vadd.xlane.f32.xlu0 %v3144_v31  ;;  %3203 = vadd.xlane.f32.xlu1 %v3152_v34  ;;  %v3156_v4 = vmul.f32 %v5135_v17, %v3124_v50  ;;  %v5273_v5 = vld [vmem:[#allocation2] ss:$0 sm:$0xff] }
 0x5c8   :  { %v4247_v35 = vpop.f32.mrb[96].mxu0  ;;  %v3154_v8 = vmul.f32 %v5135_v17, %v3122_v0  ;;  %v2301_v31 = vmul.f32 %v3677_v30, %v2293_v27 }
 0x5c9   :  { %v3095_v37 = vadd.f32 %v4247_v35, %v5157_v63  ;;  %v3005_v38 = vpop.f32.mrb[97].mxu0 }
 0x5ca   :  { %v3093_v41 = vadd.f32 %v5157_v63, %v3005_v38  ;;  %v4248_v33 = vpop.f32.mrb[98].mxu0  ;;  %v2302_v34 = vsel %vm2097_vm7, %v2301_v31, 0.0 }
 0x5cb   :  { %v3096_v46 = vadd.f32 %v4248_v33, %v5157_v63  ;;  %v3008_v43 = vpop.f32.mrb[99].mxu0  ;;  %3183 = vadd.xlane.f32.xlu0 %v3142_v36  ;;  %3199 = vadd.xlane.f32.xlu1 %v3150_v32  ;;  %v3127_v12 = vmax.f32 %v3095_v37, 0.0  ;;  %v5222_v36 = vand.u32 127, %v3040_v55 }
 0x5cc   :  { %v3094_v44 = vadd.f32 %v5157_v63, %v3008_v43  ;;  %v3125_v56 = vmax.f32 %v3093_v41, 0.0 }
 0x5cd   :  { %v3128_v59 = vmax.f32 %v3096_v46, 0.0  ;;  %v3268_v29 = vadd.s32 4294967288, %v5222_v36  ;;  %v3282_v37 = vadd.s32 4294967272, %v5222_v36  ;;  %v3266_v32 = vsub.s32 %v5222_v36, %v5116_v57 }
 0x5ce   :  { %v3157_v19 = vmul.f32 %v5135_v17, %v3125_v56  ;;  %v3126_v13 = vmax.f32 %v3094_v44, 0.0  ;;  %v3289_v50 = vadd.s32 4294967264, %v5222_v36 }
 0x5cf   :  { %3193 = vadd.xlane.f32.xlu0 %v3147_v47  ;;  %3209 = vadd.xlane.f32.xlu1 %v3155_v28  ;;  %v3160_v14 = vmul.f32 %v5135_v17, %v3128_v59  ;;  %v3271_v41 = vsub.s32 %v3268_v29, %v5116_v57  ;;  %v5234_v46 = vsub.s32 %v3282_v37, %v5116_v57  ;;  %v3310_v37 = vadd.s32 4294967240, %v5222_v36 }
 0x5d0   :  { %v4251_v52 = vpop.f32.mrb[100].mxu0  ;;  %v3158_v15 = vmul.f32 %v5135_v17, %v3126_v13 }
 0x5d1   :  { %v3099_v20 = vadd.f32 %v4251_v52, %v5157_v63  ;;  %v3021_v39 = vpop.f32.mrb[101].mxu0 }
 0x5d2   :  { %v3097_v53 = vadd.f32 %v5157_v63, %v3021_v39  ;;  %v4252_v1 = vpop.f32.mrb[102].mxu0  ;;  %v3296_v39 = vadd.s32 4294967256, %v5222_v36 }
 0x5d3   :  { %v3100_v48 = vadd.f32 %v4252_v1, %v5157_v63  ;;  %v3024_v2 = vpop.f32.mrb[103].mxu0  ;;  %3189 = vadd.xlane.f32.xlu0 %v3145_v61  ;;  %3205 = vadd.xlane.f32.xlu1 %v3153_v58  ;;  %v3131_v10 = vmax.f32 %v3099_v20, 0.0  ;;  %v3303_v61 = vadd.s32 4294967248, %v5222_v36  ;;  %v3292_v58 = vsub.s32 %v3289_v50, %v5116_v57 }
 0x5d4   :  { %v3098_v3 = vadd.f32 %v5157_v63, %v3024_v2  ;;  %v3159_v63 = vmul.f32 %v5135_v17, %v3127_v12  ;;  %v3129_v18 = vmax.f32 %v3097_v53, 0.0  ;;  %v3299_v1 = vsub.s32 %v3296_v39, %v5116_v57 }
 0x5d5   :  { %v3163_v16 = vmul.f32 %v5135_v17, %v3131_v10  ;;  %v3132_v24 = vmax.f32 %v3100_v48, 0.0  ;;  %v5249_v48 = vsub.s32 %v3303_v61, %v5116_v57  ;;  %v3345_v50 = vadd.s32 4294967200, %v5222_v36 }
 0x5d6   :  { %v3130_v22 = vmax.f32 %v3098_v3, 0.0  ;;  %v3161_v23 = vmul.f32 %v5135_v17, %v3129_v18  ;;  %v3352_v39 = vadd.s32 4294967192, %v5222_v36 }
 0x5d7   :  { %3191 = vadd.xlane.f32.xlu0 %v3146_v60  ;;  %3211 = vadd.xlane.f32.xlu1 %v3156_v4  ;;  %v3164_v51 = vmul.f32 %v5135_v17, %v3132_v24 }
 0x5d8   :  { %v3162_v26 = vmul.f32 %v5135_v17, %v3130_v22  ;;  %v3275_v17 = vadd.s32 4294967280, %v5222_v36 }
 0x5da   :  { %v5231_v33 = vsub.s32 %v3275_v17, %v5116_v57 }
 0x5db   :  { %3195 = vadd.xlane.f32.xlu0 %v3148_v7  ;;  %3207 = vadd.xlane.f32.xlu1 %v3154_v8 }
 0x5df   :  { %3217 = vadd.xlane.f32.xlu1 %v3159_v63  ;;  %2099 = vadd.xlane.f32.xlu0 %v2098_v54 }
 0x5e3   :  { %3213 = vadd.xlane.f32.xlu1 %v3157_v19 }
 0x5e7   :  { %3219 = vadd.xlane.f32.xlu1 %v3160_v14 }
 0x5eb   :  { %3215 = vadd.xlane.f32.xlu1 %v3158_v15 }
 0x5ef   :  { %3225 = vadd.xlane.f32.xlu1 %v3163_v16 }
 0x5f3   :  { %3221 = vadd.xlane.f32.xlu1 %v3161_v23 }
 0x5f7   :  { %3223 = vadd.xlane.f32.xlu1 %v3162_v26 }
 0x5fb   :  { %3227 = vadd.xlane.f32.xlu1 %v3164_v51 }
 0x5ff   :  { %2303 = vadd.xlane.f32.xlu1 %v2302_v34 }
 0x62c   :  { %v3170_v35 = vpop.xlane.xlu0 %3169 }
 0x62d   :  { %v3279_v45 = vrot.slane %v3170_v35, %v5231_v33 }
 0x630   :  { %v3166_v40 = vpop.xlane.xlu0 %3165 }
 0x631   :  { %v3267_v43 = vrot.slane %v3166_v40, %v3266_v32  ;;  %v3317_v40 = vadd.s32 4294967232, %v5222_v36 }
 0x634   :  { %v3172_v38 = vpop.xlane.xlu0 %3171 }
 0x635   :  { %v3286_v21 = vrot.slane %v3172_v38, %v5234_v46 }
 0x638   :  { %v3168_v55 = vpop.xlane.xlu0 %3167 }
 0x639   :  { %v3272_v44 = vrot.slane %v3168_v55, %v3271_v41 }
 0x63b   :  { %v3274_v47 = vsel %vm3273_vm8, %v3272_v44, %v3267_v43  ;;  %v3320_v44 = vsub.s32 %v3317_v40, %v5116_v57 }
 0x63c   :  { %v3281_v28 = vsel %vm3280_vm9, %v3279_v45, %v3274_v47  ;;  %v3178_v49 = vpop.xlane.xlu0 %3177  ;;  %v3313_v45 = vsub.s32 %v3310_v37, %v5116_v57 }
 0x63d   :  { %v3288_v52 = vsel %vm3287_vm10, %v3286_v21, %v3281_v28  ;;  %v3307_v0 = vrot.slane %v3178_v49, %v5249_v48  ;;  %v3331_v28 = vadd.s32 4294967216, %v5222_v36 }
 0x640   :  { %v3174_v20 = vpop.xlane.xlu0 %3173 }
 0x641   :  { %v3293_v2 = vrot.slane %v3174_v20, %v3292_v58 }
 0x643   :  { %v3295_v60 = vsel %vm3294_vm11, %v3293_v2, %v3288_v52  ;;  %v3338_v52 = vadd.s32 4294967208, %v5222_v36 }
 0x644   :  { %v5245_v53 = vpop.xlane.xlu0 %3179 }
 0x648   :  { %v3176_v3 = vpop.xlane.xlu0 %3175 }
 0x649   :  { %v3300_v62 = vrot.slane %v3176_v3, %v3299_v1 }
 0x64b   :  { %v3302_v4 = vsel %vm3301_vm12, %v3300_v62, %v3295_v60  ;;  %v3334_v62 = vsub.s32 %v3331_v28, %v5116_v57 }
 0x64c   :  { %v5255_v6 = vsel %vm3308_vm13, %v3307_v0, %v3302_v4  ;;  %v5257_v12 = vpop.xlane.xlu0 %3185  ;;  %v3202_v7 = vpop.xlane.xlu1 %3201  ;;  %v3341_v4 = vsub.s32 %v3338_v52, %v5116_v57 }
 0x64d   :  { %v3385_v34 = vrot.slane %v3202_v7, %v5231_v33 }
 0x650   :  { %v5259_v8 = vpop.xlane.xlu0 %3181  ;;  %v3198_v9 = vpop.xlane.xlu1 %3197 }
 0x651   :  { %v3376_v24 = vrot.slane %v3198_v9, %v3266_v32  ;;  %v3324_v32 = vadd.s32 4294967224, %v5222_v36  ;;  %v3321_v20 = vrot.slane %v5259_v8, %v3320_v44 }
 0x653   :  { %v3327_v21 = vsub.s32 %v3324_v32, %v5116_v57 }
 0x654   :  { %v5261_v56 = vpop.xlane.xlu0 %3187  ;;  %v3204_v63 = vpop.xlane.xlu1 %3203 }
 0x655   :  { %v3390_v38 = vrot.slane %v3204_v63, %v5234_v46 }
 0x658   :  { %v5263_v54 = vpop.xlane.xlu0 %3183  ;;  %v3200_v59 = vpop.xlane.xlu1 %3199 }
 0x659   :  { %v3380_v22 = vrot.slane %v3200_v59, %v3271_v41  ;;  %v3328_v2 = vrot.slane %v5263_v54, %v3327_v21  ;;  %v3355_v54 = vsub.s32 %v3352_v39, %v5116_v57  ;;  %v3366_v59 = vadd.s32 4294967176, %v5222_v36 }
 0x65b   :  { %v3381_v51 = vsel %vm3273_vm8, %v3380_v22, %v3376_v24  ;;  %vm3364_vm8 = vcmask 982912  }
 0x65c   :  { %v5265_v19 = vpop.xlane.xlu0 %3193  ;;  %v3210_v11 = vpop.xlane.xlu1 %3209  ;;  %v3386_v29 = vsel %vm3280_vm9, %v3385_v34, %v3381_v51  ;;  %vm3371_vm9 = vcmask 1048512  }
 0x65d   :  { %v3391_v43 = vsel %vm3287_vm10, %v3390_v38, %v3386_v29  ;;  %v3405_v46 = vrot.slane %v3210_v11, %v5249_v48  ;;  %vm3231_vm10 = vcmp.lt.s32.totalorder %v5222_v36, 100 }
 0x660   :  { %v5267_v13 = vpop.xlane.xlu0 %3189  ;;  %v3206_v14 = vpop.xlane.xlu1 %3205 }
 0x661   :  { %v3395_v17 = vrot.slane %v3206_v14, %v3292_v58  ;;  %v3335_v14 = vrot.slane %v5257_v12, %v3334_v62 }
 0x663   :  { %v3396_v33 = vsel %vm3294_vm11, %v3395_v17, %v3391_v43  ;;  %vm3476_vm11 = vcmask 154624  }
 0x664   :  { %v5269_v10 = vpop.xlane.xlu0 %3191  ;;  %v3212_v15 = vpop.xlane.xlu1 %3211 }
 0x665   :  { %v3410_v3 = vrot.slane %v3212_v15, %v3313_v45  ;;  %v3356_v51 = vrot.slane %v5269_v10, %v3355_v54 }
 0x668   :  { %v5271_v18 = vpop.xlane.xlu0 %3195  ;;  %v3208_v16 = vpop.xlane.xlu1 %3207 }
 0x669   :  { %v3400_v41 = vrot.slane %v3208_v16, %v3299_v1  ;;  %v3314_v1 = vrot.slane %v5245_v53, %v3313_v45  ;;  %v3348_v53 = vsub.s32 %v3345_v50, %v5116_v57 }
 0x66b   :  { %v3401_v47 = vsel %vm3301_vm12, %v3400_v41, %v3396_v33  ;;  %v3316_v60 = vsel %vm3315_vm14, %v3314_v1, %v5255_v6  ;;  %v3359_v6 = vadd.s32 4294967184, %v5222_v36 }
 0x66c   :  { %v5275_v23 = vpop.xlane.xlu1 %3217  ;;  %v2100_v25 = vpop.xlane.xlu0 %2099  ;;  %v3406_v61 = vsel %vm3308_vm13, %v3405_v46, %v3401_v47  ;;  %v3323_v8 = vsel %vm3322_vm15, %v3321_v20, %v3316_v60 }
 0x66d   :  { %v2108_v26 = vadd.f32 %v5273_v5, %v2100_v25  ;;  %v5278_v27 = vpop.f32.mrb[76].mxu1  ;;  %v3411_v7 = vsel %vm3315_vm14, %v3410_v3, %v3406_v61  ;;  %v3330_v63 = vsel %vm3329_vm1, %v3328_v2, %v3323_v8  ;;  %v3425_v15 = vrot.slane %v5275_v23, %v3334_v62 }
 0x66e   :  { %v4217_v30 = vpop.f32.mrb[77].mxu1  ;;  %v3337_v22 = vsel %vm3336_vm2, %v3335_v14, %v3330_v63  ;;  %v3349_v25 = vrot.slane %v5267_v13, %v3348_v53  ;;  %v3362_v12 = vsub.s32 %v3359_v6, %v5116_v57 }
 0x66f   :  { %v2712_v31 = vpop.f32.mrb[78].mxu1  ;;  %3460 = vrot.lane.b32.xlu1 %v2108_v26, %s4443_s8  ;;  %v3342_v30 = vrot.slane %v5261_v56, %v3341_v4  ;;  %s4471_s8 = smov 36  }
 0x670   :  { %v4218_v42 = vpop.f32.mrb[79].mxu1  ;;  %v3214_v35 = vpop.xlane.xlu1 %3213  ;;  %v3369_v31 = vsub.s32 %v3366_v59, %v5116_v57  ;;  %v3363_v10 = vrot.slane %v5265_v19, %v3362_v12  ;;  %s3518_s6 = sld [smem:[%s5339_s0 + %s4471_s8]]  }
 0x671   :  { %v3415_v58 = vrot.slane %v3214_v35, %v3320_v44  ;;  %v3344_v23 = vsel %vm3343_vm4, %v3342_v30, %v3337_v22 }
 0x672   :  { %v3351_v29 = vsel %vm3350_vm5, %v3349_v25, %v3344_v23  ;;  %v3370_v37 = vrot.slane %v5271_v18, %v3369_v31  ;;  %v3678_v18 = vld [vmem:[#allocation3] ss:$0 sm:$0xff] }
 0x673   :  { %v3416_v9 = vsel %vm3322_vm15, %v3415_v58, %v3411_v7  ;;  %v3358_v17 = vsel %vm3357_vm6, %v3356_v51, %v3351_v29 }
 0x674   :  { %v3220_v55 = vpop.xlane.xlu1 %3219  ;;  %v3365_v41 = vsel %vm3364_vm8, %v3363_v10, %v3358_v17 }
 0x675   :  { %v3430_v34 = vrot.slane %v3220_v55, %v3341_v4  ;;  %v3372_v43 = vsel %vm3371_vm9, %v3370_v37, %v3365_v41 }
 0x676   :  { %v3701_v36 = vld [vmem:[%s3518_s6] ss:$0 sm:$0xff] }
 0x677   :  { %v2710_v52 = vadd.f32 %v3701_v36, %v5278_v27 }
 0x678   :  { %v3216_v49 = vpop.xlane.xlu1 %3215 }
 0x679   :  { %v3420_v48 = vrot.slane %v3216_v49, %v3327_v21 }
 0x67b   :  { %v3421_v11 = vsel %vm3329_vm1, %v3420_v48, %v3416_v9 }
 0x67c   :  { %v3226_v0 = vpop.xlane.xlu1 %3225  ;;  %v3426_v24 = vsel %vm3336_vm2, %v3425_v15, %v3421_v11 }
 0x67d   :  { %v3431_v35 = vsel %vm3343_vm4, %v3430_v34, %v3426_v24  ;;  %v3445_v38 = vrot.slane %v3226_v0, %v3362_v12 }
 0x680   :  { %v3222_v16 = vpop.xlane.xlu1 %3221 }
 0x681   :  { %v3435_v26 = vrot.slane %v3222_v16, %v3348_v53 }
 0x683   :  { %v3436_v13 = vsel %vm3350_vm5, %v3435_v26, %v3431_v35 }
 0x684   :  { %v3224_v42 = vpop.xlane.xlu1 %3223 }
 0x685   :  { %v3440_v40 = vrot.slane %v3224_v42, %v3355_v54 }
 0x687   :  { %v3441_v56 = vsel %vm3357_vm6, %v3440_v40, %v3436_v13 }
 0x688   :  { %v3228_v32 = vpop.xlane.xlu1 %3227  ;;  %v3446_v55 = vsel %vm3364_vm8, %v3445_v38, %v3441_v56 }
 0x689   :  { %v3450_v57 = vrot.slane %v3228_v32, %v3369_v31 }
 0x68b   :  { %v3451_v44 = vsel %vm3371_vm9, %v3450_v57, %v3446_v55 }
 0x68c   :  { %v3452_v33 = vsel %vm1004_vm3, %v3451_v44, %v3372_v43  ;;  %v2304_v47 = vpop.xlane.xlu1 %2303  ;;  %vm3472_vm3 = vcmask 138240  }
 0x68d   :  { %v3454_v45 = vsel %vm3231_vm10, %v3452_v33, -inf  ;;  %v2312_v28 = vadd.f32 %v3678_v18, %v2304_v47 }
 0x68e   :  { %v3455_v21 = vsel %vm2097_vm7, %v3454_v45, -inf  ;;  %vm3474_vm7 = vcmask 146432  }
 0x68f   :  { %3456 = vmax.xlane.f32.xlu0 %v3455_v21 }
 0x6a5   :  { %3464 = vrot.lane.b32.xlu0 %v2312_v28, %s4451_s11 }
 0x6e1   :  { %v3461_v49 = vpop.permute.xlu1 %3460 }
 0x71c   :  { %v3457_v19 = vpop.xlane.xlu0 %3456 }
 0x71d   :  { %v3458_v46 = vadd.f32 %v5273_v5, %v3457_v19  ;;  %v3471_v5 = vsel %vm398_vm0, %v2710_v52, %v3461_v49 }
 0x71f   :  { %3468 = vrot.lane.b32.xlu1 %v3458_v46, %s4444_s12 }
 0x720   :  { %v3465_v50 = vpop.permute.xlu0 %3464 }
 0x721   :  { %v3473_v20 = vsel %vm3472_vm3, %v3471_v5, %v3465_v50 }
 0x791   :  { %v3469_v39 = vpop.permute.xlu1 %3468 }
 0x792   :  { %v3475_v61 = vsel %vm3474_vm7, %v3473_v20, %v3469_v39 }
 0x793   :  { %v3477_v58 = vsel %vm3476_vm11, %v3475_v61, 0.0 }
 0x794   :  { %3478 = vst [vmem:[%s3519_s13] sm:$0x3] %v3477_v58 }

</bundles_post_ra>
